<compile_context>
chip_gen: v7x
topology: tpu7x:2x2x1
jax: 0.10.0
libtpu: 0.0.40
codegen_flags: <defaults>
</compile_context>

<pallas_src>
import jax
import jax.numpy as jnp
from jax.experimental import pallas as pl
from jax.experimental.pallas import tpu as pltpu

LANE = 128     # lane width: padded hidden / output width (lane-dense stores)
MAX_TB = 512   # max batch-tile rows per grid step
VALUE_COL = LANE - 1   # column of the fused output slab that carries the value

# Stacked-layer bookkeeping (after padding every hidden layer to 128x128):
#   actor : first layer (a_obs,128) separate, then 5 stacked layers
#   critic: first layer (g_obs,128) separate, then 4 stacked layers
N_ACTOR_STACK = 5
N_CRITIC_STACK = 4


# -----------------------------------------------------------------------------
# Fused Pallas kernel
# -----------------------------------------------------------------------------
def _fused_kernel(x_ref, g_ref, wa0_ref, wc0_ref, w_ref, b_ref, out_ref):
    """x_ref:(TB,a_obs) bf16  g_ref:(TB,g_obs) bf16
       wa0_ref:(a_obs,128) bf16  wc0_ref:(g_obs,128) bf16
       w_ref:(9,128,128) bf16 stacked [actor L1..L5, critic L1..L4]
       b_ref:(11,128) f32 stacked [actor b0..b5, critic b0..b4]
       out_ref:(TB,128) f32 — logits in cols [0,n_act), value in col 127."""
    biases = b_ref[...]  # (11, 128) f32, small, loaded once

    def layer(h, w, bias_row, act):
        # bf16 operands into the MXU, f32 accumulation; bias/ReLU stay f32 (VPU).
        y = jnp.dot(h.astype(w.dtype), w, preferred_element_type=jnp.float32)
        y = y + biases[bias_row:bias_row + 1, :]
        return jnp.maximum(y, 0.0) if act else y

    # ----- actor -----
    h = layer(x_ref[...], wa0_ref[...], 0, act=True)
    for i in range(N_ACTOR_STACK):                        # w 0..4, bias 1..5
        h = layer(h, w_ref[i], 1 + i, act=(i < N_ACTOR_STACK - 1))
    logit = h                                             # cols >= n_act are 0

    # ----- critic -----
    h = layer(g_ref[...], wc0_ref[...], 6, act=True)
    for i in range(N_CRITIC_STACK):                       # w 5..8, bias 7..10
        h = layer(h, w_ref[N_ACTOR_STACK + i], 7 + i, act=(i < N_CRITIC_STACK - 1))
    value = h                                             # only col 127 non-zero

    # Padded columns of each branch are exactly zero, so a single add fuses the
    # two results into one lane-dense (TB, 128) slab (unmasked vst).
    out_ref[...] = logit + value


# -----------------------------------------------------------------------------
# Wrapper
# -----------------------------------------------------------------------------
def _pad_rows(x, rows):
    return jnp.pad(x, ((0, rows - x.shape[0]), (0, 0)))


def _const_spec(arr):
    # full array, constant index map -> DMA'd once, VMEM-resident across grid
    return pl.BlockSpec(arr.shape, lambda i: (0,) * arr.ndim)


def _pick_tile(batch):
    """Adaptive batch tile: as large as possible (<= MAX_TB) but >= 2 grid steps
    when the batch allows it (v7x megacore sharding via 'parallel')."""
    b128 = pl.cdiv(batch, LANE) * LANE
    if b128 <= LANE:
        tb = b128
    elif b128 <= 2 * MAX_TB:
        tb = b128 // 2          # multiple of 64 -> fine for bf16/f32 sublane tiling
    else:
        tb = MAX_TB
    b_pad = pl.cdiv(batch, tb) * tb
    return tb, b_pad


def mappo_compute_actor_critic(kernel_params, obs):
    agent_state = obs["agent_state"]
    global_state = obs["global_state"]
    action_mask = obs["action_mask"]

    B, a_obs = agent_state.shape
    g_obs = global_state.shape[1]
    n_act = action_mask.shape[1]
    assert n_act < VALUE_COL, "action_shape must be < 127 for the fused output slab"

    tb, b_pad = _pick_tile(B)
    grid = (b_pad // tb,)

    # Pre-cast observations to bf16 (halves input DMA; matmul inputs are bf16 anyway).
    x_p = _pad_rows(agent_state.astype(jnp.bfloat16), b_pad)
    g_p = _pad_rows(global_state.astype(jnp.bfloat16), b_pad)

    wa0 = kernel_params["w_first_actor"]     # (a_obs, 128) bf16
    wc0 = kernel_params["w_first_critic"]    # (g_obs, 128) bf16
    w_stack = kernel_params["w_stack"]       # (9, 128, 128) bf16
    b_stack = kernel_params["b_stack"]       # (11, 128) f32

    in_specs = [
        pl.BlockSpec((tb, a_obs), lambda i: (i, 0)),
        pl.BlockSpec((tb, g_obs), lambda i: (i, 0)),
        _const_spec(wa0),
        _const_spec(wc0),
        _const_spec(w_stack),
        _const_spec(b_stack),
    ]
    out_specs = pl.BlockSpec((tb, LANE), lambda i: (i, 0))
    out_shape = jax.ShapeDtypeStruct((b_pad, LANE), jnp.float32)

    flops = 2 * b_pad * (a_obs * LANE + g_obs * LANE
                         + (N_ACTOR_STACK + N_CRITIC_STACK) * LANE * LANE)
    bytes_accessed = (x_p.size * 2 + g_p.size * 2
                      + wa0.size * 2 + wc0.size * 2 + w_stack.size * 2
                      + b_stack.size * 4 + b_pad * LANE * 4)

    out_p = pl.pallas_call(
        _fused_kernel,
        out_shape=out_shape,
        grid=grid,
        in_specs=in_specs,
        out_specs=out_specs,
        compiler_params=pltpu.CompilerParams(
            dimension_semantics=("parallel",),
            vmem_limit_bytes=32 * 1024 * 1024,
        ),
        cost_estimate=pl.CostEstimate(flops=flops, transcendentals=0,
                                      bytes_accessed=bytes_accessed),
    )(x_p, g_p, wa0, wc0, w_stack, b_stack)

    logit = out_p[:B, :n_act]
    # logit[action_mask == 0] = -99999999  (wrapper-side; fuses with the slice)
    logit = jnp.where(action_mask == 0, jnp.float32(-99999999.0), logit)
    value = out_p[:B, VALUE_COL]
    return {"logit": logit, "value": value, "action_mask": action_mask}


def mappo_compute_actor(kernel_params, obs):
    out = mappo_compute_actor_critic(kernel_params, obs)
    return {"logit": out["logit"], "action_mask": out["action_mask"]}


def mappo_compute_critic(kernel_params, obs):
    out = mappo_compute_actor_critic(kernel_params, obs)
    return {"value": out["value"]}


# -----------------------------------------------------------------------------
# Parameter init (torch-equivalent logical f32 params) + kernel-ready prep
# -----------------------------------------------------------------------------
def init_params(key, agent_obs, global_obs, action_shape,
                enc_sizes=(128, 128, 64), actor_hidden=64, critic_hidden=64):
    def lin(k, fan_in, fan_out):
        kw, kb = jax.random.split(k)
        w = jax.random.normal(kw, (fan_in, fan_out), jnp.float32) * (1.0 / jnp.sqrt(fan_in))
        b = jax.random.normal(kb, (1, fan_out), jnp.float32) * 0.01
        return w, b

    keys = jax.random.split(key, 11)
    we1, be1 = lin(keys[0], agent_obs, enc_sizes[0])
    we2, be2 = lin(keys[1], enc_sizes[0], enc_sizes[1])
    we3, be3 = lin(keys[2], enc_sizes[1], enc_sizes[2])
    wa1, ba1 = lin(keys[3], actor_hidden, actor_hidden)
    wa2, ba2 = lin(keys[4], actor_hidden, actor_hidden)
    wa3, ba3 = lin(keys[5], actor_hidden, action_shape)
    wg1, bg1 = lin(keys[6], global_obs, enc_sizes[0])
    wg2, bg2 = lin(keys[7], enc_sizes[0], enc_sizes[1])
    wg3, bg3 = lin(keys[8], enc_sizes[1], enc_sizes[2])
    wc1, bc1 = lin(keys[9], critic_hidden, critic_hidden)
    wc2, bc2 = lin(keys[10], critic_hidden, 1)

    return {
        "actor": [we1, be1, we2, be2, we3, be3, wa1, ba1, wa2, ba2, wa3, ba3],
        "critic": [wg1, bg1, wg2, bg2, wg3, bg3, wc1, bc1, wc2, bc2],
    }


def prepare_kernel_params(params):
    """Pad every hidden layer to 128x128, route the critic's value output to
    column 127 of the fused output slab, stack all non-first-layer weights into
    one (9,128,128) bf16 slab and all biases into one (11,128) f32 slab."""
    H = LANE

    def pad_w(w):
        r, c = w.shape
        return jnp.pad(w, ((0, H - r), (0, H - c)))

    def pad_b(b, shift=0):
        b = b.reshape(-1)
        return jnp.pad(b, (shift, H - shift - b.shape[0]))

    (we1, be1, we2, be2, we3, be3, wa1, ba1, wa2, ba2, wa3, ba3) = params["actor"]
    (wg1, bg1, wg2, bg2, wg3, bg3, wc1, bc1, wc2, bc2) = params["critic"]

    # First layers keep their real input dims (cheap input DMA), pad output to 128.
    wa0 = jnp.pad(we1, ((0, 0), (0, H - we1.shape[1]))).astype(jnp.bfloat16)
    wc0 = jnp.pad(wg1, ((0, 0), (0, H - wg1.shape[1]))).astype(jnp.bfloat16)

    # Critic final layer: single output column routed to VALUE_COL (left-pad cols).
    wc2s = jnp.pad(wc2, ((0, H - wc2.shape[0]), (VALUE_COL, 0)))

    w_stack = jnp.stack([pad_w(we2), pad_w(we3), pad_w(wa1), pad_w(wa2), pad_w(wa3),
                         pad_w(wg2), pad_w(wg3), pad_w(wc1), wc2s]
                        ).astype(jnp.bfloat16)                       # (9,128,128)
    b_stack = jnp.stack([pad_b(be1), pad_b(be2), pad_b(be3),
                         pad_b(ba1), pad_b(ba2), pad_b(ba3),
                         pad_b(bg1), pad_b(bg2), pad_b(bg3),
                         pad_b(bc1), pad_b(bc2, shift=VALUE_COL)]
                        ).astype(jnp.float32)                        # (11,128)

    return {"w_first_actor": wa0, "w_first_critic": wc0,
            "w_stack": w_stack, "b_stack": b_stack}


# -----------------------------------------------------------------------------
# Pure-JAX reference (mirrors the kernel's bf16-matmul / f32-accumulate math)
# -----------------------------------------------------------------------------
def _ref_forward(params, obs):
    def chain(x, ps, n_relu):
        n = len(ps) // 2
        for i in range(n):
            w, b = ps[2 * i], ps[2 * i + 1]
            y = jnp.dot(x.astype(jnp.bfloat16), w.astype(jnp.bfloat16),
                        preferred_element_type=jnp.float32) + b
            x = jnp.maximum(y, 0.0) if i < n_relu else y
        return x

    logit = chain(obs["agent_state"].astype(jnp.float32), params["actor"], 5)
    logit = jnp.where(obs["action_mask"] == 0, jnp.float32(-99999999.0), logit)
    value = chain(obs["global_state"].astype(jnp.float32), params["critic"], 4)[:, 0]
    return {"logit": logit, "value": value}


# -----------------------------------------------------------------------------
if __name__ == "__main__":
    B = 8               # batch (e.g. batch * agent_num flattened)
    AGENT_OBS = 32
    GLOBAL_OBS = 48
    ACTION = 6

    key = jax.random.PRNGKey(0)
    kp, ka, kg, km = jax.random.split(key, 4)

    params = init_params(kp, AGENT_OBS, GLOBAL_OBS, ACTION)
    kernel_params = prepare_kernel_params(params)

    agent_state = jax.random.normal(ka, (B, AGENT_OBS), jnp.float32)
    global_state = jax.random.normal(kg, (B, GLOBAL_OBS), jnp.float32)
    action_mask = (jax.random.uniform(km, (B, ACTION)) > 0.3).astype(jnp.float32)

    obs = {"agent_state": agent_state,
           "global_state": global_state,
           "action_mask": action_mask}

    out = mappo_compute_actor_critic(kernel_params, obs)
    out = jax.block_until_ready(out)

    ref = _ref_forward(params, obs)
    assert out["logit"].shape == (B, ACTION)
    assert out["value"].shape == (B,)
    assert jnp.allclose(out["logit"], ref["logit"], atol=2e-2, rtol=2e-2)
    assert jnp.allclose(out["value"], ref["value"], atol=2e-2, rtol=2e-2)

    print("KERNEL_OK")
</pallas_src>

<mosaic_0001>
module attributes {stable_mosaic.version = 11 : i64} {
  func.func @_fused_kernel(%arg0: i32, %arg1: memref<128x32xbf16, #tpu.memory_space<vmem>>, %arg2: memref<128x48xbf16, #tpu.memory_space<vmem>>, %arg3: memref<32x128xbf16, #tpu.memory_space<vmem>>, %arg4: memref<48x128xbf16, #tpu.memory_space<vmem>>, %arg5: memref<9x128x128xbf16, #tpu.memory_space<vmem>>, %arg6: memref<11x128xf32, #tpu.memory_space<vmem>>, %arg7: memref<128x128xf32, #tpu.memory_space<vmem>>) attributes {dimension_semantics = [#tpu.dimension_semantics<parallel>], iteration_bounds = array<i64: 1>, scalar_prefetch = 0 : i64, scratch_operands = 0 : i64, tpu.core_type = #tpu.core_type<tc>, window_params = [{transform_indices = @transform_0, window_bounds = array<i64: 128, 32>}, {transform_indices = @transform_1, window_bounds = array<i64: 128, 48>}, {pipeline_mode = #tpu.pipeline_mode<synchronous>, transform_indices = @transform_2, window_bounds = array<i64: 32, 128>}, {pipeline_mode = #tpu.pipeline_mode<synchronous>, transform_indices = @transform_3, window_bounds = array<i64: 48, 128>}, {pipeline_mode = #tpu.pipeline_mode<synchronous>, transform_indices = @transform_4, window_bounds = array<i64: 9, 128, 128>}, {pipeline_mode = #tpu.pipeline_mode<synchronous>, transform_indices = @transform_5, window_bounds = array<i64: 11, 128>}, {transform_indices = @transform_6, window_bounds = array<i64: 128, 128>}]} {
    %c0 = arith.constant 0 : index
    %c0_0 = arith.constant 0 : index
    %0 = vector.load %arg6[%c0, %c0_0] : memref<11x128xf32, #tpu.memory_space<vmem>>, vector<11x128xf32>
    %c0_1 = arith.constant 0 : index
    %c0_2 = arith.constant 0 : index
    %1 = vector.load %arg1[%c0_1, %c0_2] : memref<128x32xbf16, #tpu.memory_space<vmem>>, vector<128x32xbf16>
    %c0_3 = arith.constant 0 : index
    %c0_4 = arith.constant 0 : index
    %2 = vector.load %arg3[%c0_3, %c0_4] : memref<32x128xbf16, #tpu.memory_space<vmem>>, vector<32x128xbf16>
    %cst = arith.constant dense<0.000000e+00> : vector<128x128xf32>
    %3 = tpu.matmul %1, %2, %cst {dimension_numbers = #tpu.dot_dimension_numbers<[1], [0], [0], [1], [0, 0, 1, 1], [], []>} : vector<128x32xbf16>, vector<32x128xbf16>, vector<128x128xf32> -> vector<128x128xf32>
    %4 = vector.extract_strided_slice %0 {offsets = [0, 0], sizes = [1, 128], strides = [1, 1]} : vector<11x128xf32> to vector<1x128xf32>
    %5 = vector.broadcast %4 : vector<1x128xf32> to vector<128x128xf32>
    %6 = arith.addf %3, %5 : vector<128x128xf32>
    %cst_5 = arith.constant 0.000000e+00 : f32
    %7 = vector.broadcast %cst_5 : f32 to vector<128x128xf32>
    %8 = arith.maximumf %6, %7 : vector<128x128xf32>
    %c0_6 = arith.constant 0 : index
    %c0_7 = arith.constant 0 : index
    %c0_8 = arith.constant 0 : index
    %9 = vector.load %arg5[%c0_6, %c0_7, %c0_8] : memref<9x128x128xbf16, #tpu.memory_space<vmem>>, vector<1x128x128xbf16>
    %10 = vector.shape_cast %9 : vector<1x128x128xbf16> to vector<128x128xbf16>
    %11 = arith.truncf %8 : vector<128x128xf32> to vector<128x128xbf16>
    %cst_9 = arith.constant dense<0.000000e+00> : vector<128x128xf32>
    %12 = tpu.matmul %11, %10, %cst_9 {dimension_numbers = #tpu.dot_dimension_numbers<[1], [0], [0], [1], [0, 0, 1, 1], [], []>} : vector<128x128xbf16>, vector<128x128xbf16>, vector<128x128xf32> -> vector<128x128xf32>
    %13 = vector.extract_strided_slice %0 {offsets = [1, 0], sizes = [1, 128], strides = [1, 1]} : vector<11x128xf32> to vector<1x128xf32>
    %14 = vector.broadcast %13 : vector<1x128xf32> to vector<128x128xf32>
    %15 = arith.addf %12, %14 : vector<128x128xf32>
    %cst_10 = arith.constant 0.000000e+00 : f32
    %16 = vector.broadcast %cst_10 : f32 to vector<128x128xf32>
    %17 = arith.maximumf %15, %16 : vector<128x128xf32>
    %c1 = arith.constant 1 : index
    %c0_11 = arith.constant 0 : index
    %c0_12 = arith.constant 0 : index
    %18 = vector.load %arg5[%c1, %c0_11, %c0_12] : memref<9x128x128xbf16, #tpu.memory_space<vmem>>, vector<1x128x128xbf16>
    %19 = vector.shape_cast %18 : vector<1x128x128xbf16> to vector<128x128xbf16>
    %20 = arith.truncf %17 : vector<128x128xf32> to vector<128x128xbf16>
    %cst_13 = arith.constant dense<0.000000e+00> : vector<128x128xf32>
    %21 = tpu.matmul %20, %19, %cst_13 {dimension_numbers = #tpu.dot_dimension_numbers<[1], [0], [0], [1], [0, 0, 1, 1], [], []>} : vector<128x128xbf16>, vector<128x128xbf16>, vector<128x128xf32> -> vector<128x128xf32>
    %22 = vector.extract_strided_slice %0 {offsets = [2, 0], sizes = [1, 128], strides = [1, 1]} : vector<11x128xf32> to vector<1x128xf32>
    %23 = vector.broadcast %22 : vector<1x128xf32> to vector<128x128xf32>
    %24 = arith.addf %21, %23 : vector<128x128xf32>
    %cst_14 = arith.constant 0.000000e+00 : f32
    %25 = vector.broadcast %cst_14 : f32 to vector<128x128xf32>
    %26 = arith.maximumf %24, %25 : vector<128x128xf32>
    %c2 = arith.constant 2 : index
    %c0_15 = arith.constant 0 : index
    %c0_16 = arith.constant 0 : index
    %27 = vector.load %arg5[%c2, %c0_15, %c0_16] : memref<9x128x128xbf16, #tpu.memory_space<vmem>>, vector<1x128x128xbf16>
    %28 = vector.shape_cast %27 : vector<1x128x128xbf16> to vector<128x128xbf16>
    %29 = arith.truncf %26 : vector<128x128xf32> to vector<128x128xbf16>
    %cst_17 = arith.constant dense<0.000000e+00> : vector<128x128xf32>
    %30 = tpu.matmul %29, %28, %cst_17 {dimension_numbers = #tpu.dot_dimension_numbers<[1], [0], [0], [1], [0, 0, 1, 1], [], []>} : vector<128x128xbf16>, vector<128x128xbf16>, vector<128x128xf32> -> vector<128x128xf32>
    %31 = vector.extract_strided_slice %0 {offsets = [3, 0], sizes = [1, 128], strides = [1, 1]} : vector<11x128xf32> to vector<1x128xf32>
    %32 = vector.broadcast %31 : vector<1x128xf32> to vector<128x128xf32>
    %33 = arith.addf %30, %32 : vector<128x128xf32>
    %cst_18 = arith.constant 0.000000e+00 : f32
    %34 = vector.broadcast %cst_18 : f32 to vector<128x128xf32>
    %35 = arith.maximumf %33, %34 : vector<128x128xf32>
    %c3 = arith.constant 3 : index
    %c0_19 = arith.constant 0 : index
    %c0_20 = arith.constant 0 : index
    %36 = vector.load %arg5[%c3, %c0_19, %c0_20] : memref<9x128x128xbf16, #tpu.memory_space<vmem>>, vector<1x128x128xbf16>
    %37 = vector.shape_cast %36 : vector<1x128x128xbf16> to vector<128x128xbf16>
    %38 = arith.truncf %35 : vector<128x128xf32> to vector<128x128xbf16>
    %cst_21 = arith.constant dense<0.000000e+00> : vector<128x128xf32>
    %39 = tpu.matmul %38, %37, %cst_21 {dimension_numbers = #tpu.dot_dimension_numbers<[1], [0], [0], [1], [0, 0, 1, 1], [], []>} : vector<128x128xbf16>, vector<128x128xbf16>, vector<128x128xf32> -> vector<128x128xf32>
    %40 = vector.extract_strided_slice %0 {offsets = [4, 0], sizes = [1, 128], strides = [1, 1]} : vector<11x128xf32> to vector<1x128xf32>
    %41 = vector.broadcast %40 : vector<1x128xf32> to vector<128x128xf32>
    %42 = arith.addf %39, %41 : vector<128x128xf32>
    %cst_22 = arith.constant 0.000000e+00 : f32
    %43 = vector.broadcast %cst_22 : f32 to vector<128x128xf32>
    %44 = arith.maximumf %42, %43 : vector<128x128xf32>
    %c4 = arith.constant 4 : index
    %c0_23 = arith.constant 0 : index
    %c0_24 = arith.constant 0 : index
    %45 = vector.load %arg5[%c4, %c0_23, %c0_24] : memref<9x128x128xbf16, #tpu.memory_space<vmem>>, vector<1x128x128xbf16>
    %46 = vector.shape_cast %45 : vector<1x128x128xbf16> to vector<128x128xbf16>
    %47 = arith.truncf %44 : vector<128x128xf32> to vector<128x128xbf16>
    %cst_25 = arith.constant dense<0.000000e+00> : vector<128x128xf32>
    %48 = tpu.matmul %47, %46, %cst_25 {dimension_numbers = #tpu.dot_dimension_numbers<[1], [0], [0], [1], [0, 0, 1, 1], [], []>} : vector<128x128xbf16>, vector<128x128xbf16>, vector<128x128xf32> -> vector<128x128xf32>
    %49 = vector.extract_strided_slice %0 {offsets = [5, 0], sizes = [1, 128], strides = [1, 1]} : vector<11x128xf32> to vector<1x128xf32>
    %50 = vector.broadcast %49 : vector<1x128xf32> to vector<128x128xf32>
    %51 = arith.addf %48, %50 : vector<128x128xf32>
    %c0_26 = arith.constant 0 : index
    %c0_27 = arith.constant 0 : index
    %52 = vector.load %arg2[%c0_26, %c0_27] : memref<128x48xbf16, #tpu.memory_space<vmem>>, vector<128x48xbf16>
    %c0_28 = arith.constant 0 : index
    %c0_29 = arith.constant 0 : index
    %53 = vector.load %arg4[%c0_28, %c0_29] : memref<48x128xbf16, #tpu.memory_space<vmem>>, vector<48x128xbf16>
    %cst_30 = arith.constant dense<0.000000e+00> : vector<128x128xf32>
    %54 = tpu.matmul %52, %53, %cst_30 {dimension_numbers = #tpu.dot_dimension_numbers<[1], [0], [0], [1], [0, 0, 1, 1], [], []>} : vector<128x48xbf16>, vector<48x128xbf16>, vector<128x128xf32> -> vector<128x128xf32>
    %55 = vector.extract_strided_slice %0 {offsets = [6, 0], sizes = [1, 128], strides = [1, 1]} : vector<11x128xf32> to vector<1x128xf32>
    %56 = vector.broadcast %55 : vector<1x128xf32> to vector<128x128xf32>
    %57 = arith.addf %54, %56 : vector<128x128xf32>
    %cst_31 = arith.constant 0.000000e+00 : f32
    %58 = vector.broadcast %cst_31 : f32 to vector<128x128xf32>
    %59 = arith.maximumf %57, %58 : vector<128x128xf32>
    %c5 = arith.constant 5 : index
    %c0_32 = arith.constant 0 : index
    %c0_33 = arith.constant 0 : index
    %60 = vector.load %arg5[%c5, %c0_32, %c0_33] : memref<9x128x128xbf16, #tpu.memory_space<vmem>>, vector<1x128x128xbf16>
    %61 = vector.shape_cast %60 : vector<1x128x128xbf16> to vector<128x128xbf16>
    %62 = arith.truncf %59 : vector<128x128xf32> to vector<128x128xbf16>
    %cst_34 = arith.constant dense<0.000000e+00> : vector<128x128xf32>
    %63 = tpu.matmul %62, %61, %cst_34 {dimension_numbers = #tpu.dot_dimension_numbers<[1], [0], [0], [1], [0, 0, 1, 1], [], []>} : vector<128x128xbf16>, vector<128x128xbf16>, vector<128x128xf32> -> vector<128x128xf32>
    %64 = vector.extract_strided_slice %0 {offsets = [7, 0], sizes = [1, 128], strides = [1, 1]} : vector<11x128xf32> to vector<1x128xf32>
    %65 = vector.broadcast %64 : vector<1x128xf32> to vector<128x128xf32>
    %66 = arith.addf %63, %65 : vector<128x128xf32>
    %cst_35 = arith.constant 0.000000e+00 : f32
    %67 = vector.broadcast %cst_35 : f32 to vector<128x128xf32>
    %68 = arith.maximumf %66, %67 : vector<128x128xf32>
    %c6 = arith.constant 6 : index
    %c0_36 = arith.constant 0 : index
    %c0_37 = arith.constant 0 : index
    %69 = vector.load %arg5[%c6, %c0_36, %c0_37] : memref<9x128x128xbf16, #tpu.memory_space<vmem>>, vector<1x128x128xbf16>
    %70 = vector.shape_cast %69 : vector<1x128x128xbf16> to vector<128x128xbf16>
    %71 = arith.truncf %68 : vector<128x128xf32> to vector<128x128xbf16>
    %cst_38 = arith.constant dense<0.000000e+00> : vector<128x128xf32>
    %72 = tpu.matmul %71, %70, %cst_38 {dimension_numbers = #tpu.dot_dimension_numbers<[1], [0], [0], [1], [0, 0, 1, 1], [], []>} : vector<128x128xbf16>, vector<128x128xbf16>, vector<128x128xf32> -> vector<128x128xf32>
    %73 = vector.extract_strided_slice %0 {offsets = [8, 0], sizes = [1, 128], strides = [1, 1]} : vector<11x128xf32> to vector<1x128xf32>
    %74 = vector.broadcast %73 : vector<1x128xf32> to vector<128x128xf32>
    %75 = arith.addf %72, %74 : vector<128x128xf32>
    %cst_39 = arith.constant 0.000000e+00 : f32
    %76 = vector.broadcast %cst_39 : f32 to vector<128x128xf32>
    %77 = arith.maximumf %75, %76 : vector<128x128xf32>
    %c7 = arith.constant 7 : index
    %c0_40 = arith.constant 0 : index
    %c0_41 = arith.constant 0 : index
    %78 = vector.load %arg5[%c7, %c0_40, %c0_41] : memref<9x128x128xbf16, #tpu.memory_space<vmem>>, vector<1x128x128xbf16>
    %79 = vector.shape_cast %78 : vector<1x128x128xbf16> to vector<128x128xbf16>
    %80 = arith.truncf %77 : vector<128x128xf32> to vector<128x128xbf16>
    %cst_42 = arith.constant dense<0.000000e+00> : vector<128x128xf32>
    %81 = tpu.matmul %80, %79, %cst_42 {dimension_numbers = #tpu.dot_dimension_numbers<[1], [0], [0], [1], [0, 0, 1, 1], [], []>} : vector<128x128xbf16>, vector<128x128xbf16>, vector<128x128xf32> -> vector<128x128xf32>
    %82 = vector.extract_strided_slice %0 {offsets = [9, 0], sizes = [1, 128], strides = [1, 1]} : vector<11x128xf32> to vector<1x128xf32>
    %83 = vector.broadcast %82 : vector<1x128xf32> to vector<128x128xf32>
    %84 = arith.addf %81, %83 : vector<128x128xf32>
    %cst_43 = arith.constant 0.000000e+00 : f32
    %85 = vector.broadcast %cst_43 : f32 to vector<128x128xf32>
    %86 = arith.maximumf %84, %85 : vector<128x128xf32>
    %c8 = arith.constant 8 : index
    %c0_44 = arith.constant 0 : index
    %c0_45 = arith.constant 0 : index
    %87 = vector.load %arg5[%c8, %c0_44, %c0_45] : memref<9x128x128xbf16, #tpu.memory_space<vmem>>, vector<1x128x128xbf16>
    %88 = vector.shape_cast %87 : vector<1x128x128xbf16> to vector<128x128xbf16>
    %89 = arith.truncf %86 : vector<128x128xf32> to vector<128x128xbf16>
    %cst_46 = arith.constant dense<0.000000e+00> : vector<128x128xf32>
    %90 = tpu.matmul %89, %88, %cst_46 {dimension_numbers = #tpu.dot_dimension_numbers<[1], [0], [0], [1], [0, 0, 1, 1], [], []>} : vector<128x128xbf16>, vector<128x128xbf16>, vector<128x128xf32> -> vector<128x128xf32>
    %91 = vector.extract_strided_slice %0 {offsets = [10, 0], sizes = [1, 128], strides = [1, 1]} : vector<11x128xf32> to vector<1x128xf32>
    %92 = vector.broadcast %91 : vector<1x128xf32> to vector<128x128xf32>
    %93 = arith.addf %90, %92 : vector<128x128xf32>
    %94 = arith.addf %51, %93 : vector<128x128xf32>
    %c0_47 = arith.constant 0 : index
    %c0_48 = arith.constant 0 : index
    %95 = vector.load %arg7[%c0_47, %c0_48] : memref<128x128xf32, #tpu.memory_space<vmem>>, vector<128x128xf32>
    tpu.vector_store %arg7[%c0_47, %c0_48], %94 {strides = array<i32>} : memref<128x128xf32, #tpu.memory_space<vmem>>, vector<128x128xf32>,
    return
  }
  func.func @transform_0(%arg0: i32) -> (i32, i32) {
    %c0_i32 = arith.constant 0 : i32
    %c0_i32_0 = arith.constant 0 : i32
    return %arg0, %c0_i32 : i32, i32
  }
  func.func @transform_1(%arg0: i32) -> (i32, i32) {
    %c0_i32 = arith.constant 0 : i32
    %c0_i32_0 = arith.constant 0 : i32
    return %arg0, %c0_i32 : i32, i32
  }
  func.func @transform_2(%arg0: i32) -> (i32, i32) {
    %c0_i32 = arith.constant 0 : i32
    %c0_i32_0 = arith.constant 0 : i32
    %c0_i32_1 = arith.constant 0 : i32
    return %c0_i32, %c0_i32_0 : i32, i32
  }
  func.func @transform_3(%arg0: i32) -> (i32, i32) {
    %c0_i32 = arith.constant 0 : i32
    %c0_i32_0 = arith.constant 0 : i32
    %c0_i32_1 = arith.constant 0 : i32
    return %c0_i32, %c0_i32_0 : i32, i32
  }
  func.func @transform_4(%arg0: i32) -> (i32, i32, i32) {
    %c0_i32 = arith.constant 0 : i32
    %c0_i32_0 = arith.constant 0 : i32
    %c0_i32_1 = arith.constant 0 : i32
    %c0_i32_2 = arith.constant 0 : i32
    return %c0_i32, %c0_i32_0, %c0_i32_1 : i32, i32, i32
  }
  func.func @transform_5(%arg0: i32) -> (i32, i32) {
    %c0_i32 = arith.constant 0 : i32
    %c0_i32_0 = arith.constant 0 : i32
    %c0_i32_1 = arith.constant 0 : i32
    return %c0_i32, %c0_i32_0 : i32, i32
  }
  func.func @transform_6(%arg0: i32) -> (i32, i32) {
    %c0_i32 = arith.constant 0 : i32
    %c0_i32_0 = arith.constant 0 : i32
    return %arg0, %c0_i32 : i32, i32
  }
}

</mosaic_0001>

<bundles_post_ra>
// kernel: tpu_custom_call.1
= control target key start
LH: loop header
LB: loop body
LE: loop exit
PB: predicated region body
PF: predicated region fallthrough
CT: control target
= control target key end

     0   :  { %11 = vsyncpa [#allocation3], 0  ;;  %s3285_s0 = inlined_call_operand.vmem [shape: bf16[128,32], index: 0, kind: input, shape index: {}]   ;;  %s3286_s1 = inlined_call_operand.vmem [shape: bf16[128,48], index: 1, kind: input, shape index: {}]   ;;  %s3287_s2 = inlined_call_operand.vmem [shape: bf16[32,128], index: 2, kind: input, shape index: {}]   ;;  %s3288_s3 = inlined_call_operand.vmem [shape: bf16[48,128], index: 3, kind: input, shape index: {}]   ;;  %s3289_s4 = inlined_call_operand.hbm [shape: bf16[9,128,128], index: 4, kind: input, shape index: {}]   ;;  %s3290_s5 = inlined_call_operand.vmem [shape: f32[11,128], index: 5, kind: input, shape index: {}]   ;;  %s3291_s6 = inlined_call_operand.hbm [shape: f32[128,128], index: 6, kind: output, shape index: {}]  }
   0x1   :  { %12 = vsyncpa [#allocation4], 0  ;;  %s3003_s21 = smov [#allocation2]   ;;  %s2955_s25 = scalar_lea.hbm %s3289_s4, 9216 }
   0x2   :  { %s26_s22 = sshll.u32 %s3003_s21, 4  ;;  %p2956_p0 = scmp.ne.s32.totalorder %s3289_s4, %s2955_s25  ;;  %s27_s22 = int_to_ptr.vmem [resolvable:$true] %s26_s22 }
   0x3   :  { %p2959_p1 = scmp.lt.u32.totalorder %s2955_s25, %s3289_s4 }
   0x5   :  { %p2961_p2 = pnand %p2959_p1, %p2956_p0 }
   0x7   :  { %2964 = shalt.err (!%p2961_p2)
}
   0x8   :  { %s2965_s30 = scalar_lea.vmem %s27_s22, 9216  ;;  %p2970_p4 = scmp.lt.s32.totalorder %s27_s22, %s27_s22 }
   0x9   :  { %p2966_p3 = scmp.ne.s32.totalorder %s27_s22, %s2965_s30  ;;  %p2971_p5 = scmp.lt.s32.totalorder %s2965_s30, %s2965_s30 }
   0xb   :  { %p2972_p6 = por %p2971_p5, %p2970_p4 }
   0xd   :  { %p2973_p7 = pnand %p2972_p6, %p2966_p3 }
   0xf   :  { %2976 = shalt.err (!%p2973_p7)
}
  0x10   :  { %s3004_s7 = smov 64   ;;  %s3005_s8 = smov 4  }
  0x11   :  { %32 = dma.hbm_to_vmem [thread:$0]  %s3289_s4, 9216, %s27_s22, [#allocation3], %s3004_s7, %s3004_s7, %s3005_s8  }
  0x12   :  { %2999 = dma.done.wait [#allocation3], 9216  }
  0x13   :  { %3000 = vsyncadd [#allocation3], 4294958080  ;;  %v2861_v0 = vld [vmem:[%s3287_s2] sm:$0xff]   ;;  %v2862_v1 = vld [vmem:[%s3287_s2 + $0x8] sm:$0xff]   ;;  %vm117_vm0 = vcmask 261120   ;;  %v61_v19 = vlaneseq  ;;  %vm1272_vm1 = vcmask 392192  }
  0x14   :  { %2477 = vmatprep.subr.bf16.mxu0 %v2861_v0  ;;  %v2863_v2 = vld [vmem:[%s3285_s0] sm:$0xff]   ;;  %v2864_v3 = vld [vmem:[%s3285_s0 + $0x8] sm:$0xff]   ;;  %v2865_v4 = vld [vmem:[%s3285_s0 + $0x10] sm:$0xff]  }
  0x15   :  { %2478 = vmatpush3.bf16.msra.mxu0 %v2861_v0  ;;  %2481 = vmatprep.mubr.msk.bf16.mxu0 %vm117_vm0, %v2863_v2  ;;  %v2871_v5 = vld [vmem:[#allocation2] sm:$0xff]   ;;  %v2872_v6 = vld [vmem:[#allocation2 + $0x8] sm:$0xff]   ;;  %v2866_v7 = vld [vmem:[%s3285_s0 + $0x18] sm:$0xff]   ;;  %v3094_v20 = vshrl.u32 %v61_v19, 7 }
  0x16   :  { %2479 = vmatprep.subr.bf16.mxu0 %v2862_v1  ;;  %v2873_v8 = vld [vmem:[#allocation2 + $0x10] sm:$0xff]   ;;  %v2867_v9 = vld [vmem:[%s3285_s0 + $0x20] sm:$0xff]   ;;  %v2874_v10 = vld [vmem:[#allocation2 + $0x18] sm:$0xff]  }
  0x17   :  { %v2868_v11 = vld [vmem:[%s3285_s0 + $0x28] sm:$0xff]   ;;  %v2875_v12 = vld [vmem:[#allocation2 + $0x20] sm:$0xff]   ;;  %v2869_v13 = vld [vmem:[%s3285_s0 + $0x30] sm:$0xff]   ;;  %v63_v21 = vsub.s32 0, %v3094_v20 }
  0x18   :  { %v2876_v14 = vld [vmem:[#allocation2 + $0x28] sm:$0xff]   ;;  %v2870_v15 = vld [vmem:[%s3285_s0 + $0x38] sm:$0xff]   ;;  %v2877_v16 = vld [vmem:[#allocation2 + $0x30] sm:$0xff]  }
  0x19   :  { %2480 = vmatpush3.bf16.msra.mxu0 %v2862_v1  ;;  %v2878_v17 = vld [vmem:[#allocation2 + $0x38] sm:$0xff]   ;;  %v2879_v18 = vld [vmem:[#allocation2 + $0x40] sm:$0xff]   ;;  %v2880_v41 = vld [vmem:[#allocation2 + $0x48] sm:$0xff]  }
  0x1a   :  { %2497 = vmatprep.subr.bf16.mxu0 %v2871_v5  ;;  %v3100_v22 = vld [vmem:[%s3290_s5] sm:$0xff]  ;;  %v2881_v49 = vld [vmem:[#allocation2 + $0x50] sm:$0xff]   ;;  %v2882_v57 = vld [vmem:[#allocation2 + $0x58] sm:$0xff]  }
  0x1b   :  { %v3105_v23 = vrot.slane %v3100_v22, %v63_v21  ;;  %v2883_v1 = vld [vmem:[#allocation2 + $0x60] sm:$0xff]  }
  0x1c   :  { %2482 = vmatmul.mubr.msk.bf16.vlgmr.msra.gmra.mrb[0].mxu0 %vm117_vm0, %v2864_v3 }
  0x1d   :  { %2485 = vmatprep.mubr.msk.bf16.mxu0 %vm117_vm0, %v2865_v4  ;;  %2498 = vmatpush3.bf16.msra.mxu0 %v2871_v5 }
  0x1e   :  { %2499 = vmatprep.subr.bf16.mxu0 %v2872_v6 }
  0x21   :  { %2500 = vmatpush3.bf16.msra.mxu0 %v2872_v6 }
  0x22   :  { %2501 = vmatprep.subr.bf16.mxu0 %v2873_v8 }
  0x24   :  { %2486 = vmatmul.mubr.msk.bf16.gmra.mrb[4].mxu0 %vm117_vm0, %v2866_v7 }
  0x25   :  { %2489 = vmatprep.mubr.msk.bf16.mxu0 %vm117_vm0, %v2867_v9  ;;  %2502 = vmatpush3.bf16.msra.mxu0 %v2873_v8  ;;  %v2884_v9 = vld [vmem:[#allocation2 + $0x68] sm:$0xff]  }
  0x26   :  { %2503 = vmatprep.subr.bf16.mxu0 %v2874_v10 }
  0x29   :  { %2504 = vmatpush3.bf16.msra.mxu0 %v2874_v10 }
  0x2a   :  { %2505 = vmatprep.subr.bf16.mxu0 %v2875_v12 }
  0x2c   :  { %2490 = vmatmul.mubr.msk.bf16.gmra.mrb[8].mxu0 %vm117_vm0, %v2868_v11 }
  0x2d   :  { %2493 = vmatprep.mubr.msk.bf16.mxu0 %vm117_vm0, %v2869_v13  ;;  %2506 = vmatpush3.bf16.msra.mxu0 %v2875_v12 }
  0x2e   :  { %2507 = vmatprep.subr.bf16.mxu0 %v2876_v14 }
  0x31   :  { %2508 = vmatpush3.bf16.msra.mxu0 %v2876_v14 }
  0x32   :  { %2509 = vmatprep.subr.bf16.mxu0 %v2877_v16 }
  0x34   :  { %2494 = vmatmul.mubr.msk.bf16.gmra.mrb[12].mxu0 %vm117_vm0, %v2870_v15 }
  0x35   :  { %2510 = vmatpush3.bf16.msra.mxu0 %v2877_v16 }
  0x36   :  { %2511 = vmatprep.subr.bf16.mxu0 %v2878_v17 }
  0x39   :  { %2512 = vmatpush3.bf16.msra.mxu0 %v2878_v17 }
  0x3a   :  { %2529 = vmatprep.subr.bf16.mxu0 %v2879_v18 }
  0xef   :  { %v2483_v24 = vpop.f32.mrb[0].mxu0 }
  0xf0   :  { %v185_v25 = vadd.f32 %v2483_v24, %v3105_v23  ;;  %v176_v26 = vpop.f32.mrb[1].mxu0 }
  0xf1   :  { %v177_v27 = vadd.f32 %v176_v26, %v3105_v23  ;;  %v2484_v28 = vpop.f32.mrb[2].mxu0  ;;  %v2886_v26 = vld [vmem:[#allocation2 + $0x78] sm:$0xff]  }
  0xf2   :  { %v188_v29 = vadd.f32 %v2484_v28, %v3105_v23  ;;  %v179_v30 = vpop.f32.mrb[3].mxu0  ;;  %v241_v32 = vmax.f32 %v185_v25, 0.0  ;;  %v2885_v25 = vld [vmem:[#allocation2 + $0x70] sm:$0xff]   ;;  %v2888_v28 = vld [vmem:[#allocation2 + $0x88] sm:$0xff]  }
  0xf3   :  { %v180_v31 = vadd.f32 %v179_v30, %v3105_v23  ;;  %v239_v34 = vmax.f32 %v177_v27, 0.0  ;;  %v2887_v27 = vld [vmem:[#allocation2 + $0x80] sm:$0xff]  }
  0xf4   :  { %v242_v33 = vmax.f32 %v188_v29, 0.0  ;;  %2561 = vmatprep.subr.bf16.mxu1 %v2887_v27  ;;  %v2890_v29 = vld [vmem:[#allocation2 + $0x98] sm:$0xff]   ;;  %v2891_v30 = vld [vmem:[#allocation2 + $0xa0] sm:$0xff]  }
  0xf5   :  { %v240_v35 = vmax.f32 %v180_v31, 0.0  ;;  %2562 = vmatpush3.bf16.msra.mxu1 %v2887_v27  ;;  %v2892_v31 = vld [vmem:[#allocation2 + $0xa8] sm:$0xff]  }
  0xf6   :  { %v272_v36 = vpack.c.bf16 %v242_v33, %v241_v32  ;;  %2563 = vmatprep.subr.bf16.mxu1 %v2888_v28  ;;  %v281_v32 = vsub.s32 1, %v3094_v20 }
  0xf7   :  { %v271_v37 = vpack.c.bf16 %v240_v35, %v239_v34  ;;  %v2487_v38 = vpop.f32.mrb[4].mxu0 }
  0xf8   :  { %v201_v39 = vadd.f32 %v2487_v38, %v3105_v23  ;;  %v192_v40 = vpop.f32.mrb[5].mxu0  ;;  %v282_v33 = vrot.slane %v3100_v22, %v281_v32 }
  0xf9   :  { %v193_v42 = vadd.f32 %v192_v40, %v3105_v23  ;;  %v2488_v43 = vpop.f32.mrb[6].mxu0  ;;  %2513 = vmatprep.mubr.bf16.mxu0 %v271_v37  ;;  %2564 = vmatpush3.bf16.msra.mxu1 %v2888_v28 }
  0xfa   :  { %v204_v44 = vadd.f32 %v2488_v43, %v3105_v23  ;;  %v195_v45 = vpop.f32.mrb[7].mxu0  ;;  %2514 = vmatmul.mubr.bf16.vlgmr.msra.gmra.mrb[16].mxu0 %v272_v36  ;;  %v245_v47 = vmax.f32 %v201_v39, 0.0 }
  0xfb   :  { %v196_v46 = vadd.f32 %v195_v45, %v3105_v23  ;;  %2530 = vmatpush3.bf16.msra.mxu0 %v2879_v18  ;;  %v243_v50 = vmax.f32 %v193_v42, 0.0 }
  0xfc   :  { %v246_v48 = vmax.f32 %v204_v44, 0.0  ;;  %2531 = vmatprep.subr.bf16.mxu0 %v2880_v41 }
  0xfd   :  { %v244_v51 = vmax.f32 %v196_v46, 0.0 }
  0xfe   :  { %v274_v52 = vpack.c.bf16 %v246_v48, %v245_v47 }
  0xff   :  { %v273_v53 = vpack.c.bf16 %v244_v51, %v243_v50  ;;  %v2491_v54 = vpop.f32.mrb[8].mxu0  ;;  %2532 = vmatpush3.bf16.msra.mxu0 %v2880_v41 }
 0x100   :  { %v217_v55 = vadd.f32 %v2491_v54, %v3105_v23  ;;  %v208_v56 = vpop.f32.mrb[9].mxu0  ;;  %2533 = vmatprep.subr.bf16.mxu0 %v2881_v49 }
 0x101   :  { %v209_v58 = vadd.f32 %v208_v56, %v3105_v23  ;;  %v2492_v59 = vpop.f32.mrb[10].mxu0  ;;  %2517 = vmatprep.mubr.bf16.mxu0 %v273_v53 }
 0x102   :  { %v220_v60 = vadd.f32 %v2492_v59, %v3105_v23  ;;  %v211_v61 = vpop.f32.mrb[11].mxu0  ;;  %2518 = vmatmul.mubr.bf16.gmra.mrb[20].mxu0 %v274_v52  ;;  %v249_v63 = vmax.f32 %v217_v55, 0.0 }
 0x103   :  { %v212_v62 = vadd.f32 %v211_v61, %v3105_v23  ;;  %2534 = vmatpush3.bf16.msra.mxu0 %v2881_v49  ;;  %v247_v2 = vmax.f32 %v209_v58, 0.0 }
 0x104   :  { %v250_v0 = vmax.f32 %v220_v60, 0.0  ;;  %2535 = vmatprep.subr.bf16.mxu0 %v2882_v57 }
 0x105   :  { %v248_v3 = vmax.f32 %v212_v62, 0.0 }
 0x106   :  { %v276_v4 = vpack.c.bf16 %v250_v0, %v249_v63 }
 0x107   :  { %v275_v5 = vpack.c.bf16 %v248_v3, %v247_v2  ;;  %v2495_v6 = vpop.f32.mrb[12].mxu0  ;;  %2536 = vmatpush3.bf16.msra.mxu0 %v2882_v57 }
 0x108   :  { %v233_v7 = vadd.f32 %v2495_v6, %v3105_v23  ;;  %v224_v8 = vpop.f32.mrb[13].mxu0  ;;  %2537 = vmatprep.subr.bf16.mxu0 %v2883_v1 }
 0x109   :  { %v225_v10 = vadd.f32 %v224_v8, %v3105_v23  ;;  %v2496_v11 = vpop.f32.mrb[14].mxu0  ;;  %2521 = vmatprep.mubr.bf16.mxu0 %v275_v5 }
 0x10a   :  { %v236_v12 = vadd.f32 %v2496_v11, %v3105_v23  ;;  %v227_v13 = vpop.f32.mrb[15].mxu0  ;;  %2522 = vmatmul.mubr.bf16.gmra.mrb[24].mxu0 %v276_v4  ;;  %v253_v15 = vmax.f32 %v233_v7, 0.0 }
 0x10b   :  { %v228_v14 = vadd.f32 %v227_v13, %v3105_v23  ;;  %2538 = vmatpush3.bf16.msra.mxu0 %v2883_v1  ;;  %v251_v17 = vmax.f32 %v225_v10, 0.0  ;;  %v2889_v23 = vld [vmem:[#allocation2 + $0x90] sm:$0xff]  }
 0x10c   :  { %v254_v16 = vmax.f32 %v236_v12, 0.0  ;;  %2539 = vmatprep.subr.bf16.mxu0 %v2884_v9  ;;  %2565 = vmatprep.subr.bf16.mxu1 %v2889_v23 }
 0x10d   :  { %v252_v18 = vmax.f32 %v228_v14, 0.0  ;;  %2566 = vmatpush3.bf16.msra.mxu1 %v2889_v23 }
 0x10e   :  { %v278_v19 = vpack.c.bf16 %v254_v16, %v253_v15  ;;  %2567 = vmatprep.subr.bf16.mxu1 %v2890_v29 }
 0x10f   :  { %v277_v24 = vpack.c.bf16 %v252_v18, %v251_v17  ;;  %2540 = vmatpush3.bf16.msra.mxu0 %v2884_v9 }
 0x110   :  { %2541 = vmatprep.subr.bf16.mxu0 %v2885_v25 }
 0x111   :  { %2525 = vmatprep.mubr.bf16.mxu0 %v277_v24  ;;  %2568 = vmatpush3.bf16.msra.mxu1 %v2890_v29  ;;  %v2893_v29 = vld [vmem:[#allocation2 + $0xb0] sm:$0xff]  }
 0x112   :  { %2526 = vmatmul.mubr.bf16.gmra.mrb[28].mxu0 %v278_v19  ;;  %2569 = vmatprep.subr.bf16.mxu1 %v2891_v30 }
 0x113   :  { %2542 = vmatpush3.bf16.msra.mxu0 %v2885_v25 }
 0x114   :  { %2543 = vmatprep.subr.bf16.mxu0 %v2886_v26 }
 0x115   :  { %2570 = vmatpush3.bf16.msra.mxu1 %v2891_v30  ;;  %v2894_v30 = vld [vmem:[#allocation2 + $0xb8] sm:$0xff]  }
 0x116   :  { %2571 = vmatprep.subr.bf16.mxu1 %v2892_v31 }
 0x117   :  { %2544 = vmatpush3.bf16.msra.mxu0 %v2886_v26 }
 0x119   :  { %2572 = vmatpush3.bf16.msra.mxu1 %v2892_v31  ;;  %v2895_v31 = vld [vmem:[#allocation2 + $0xc0] sm:$0xff]  }
 0x11a   :  { %2573 = vmatprep.subr.bf16.mxu1 %v2893_v29  ;;  %2593 = vmatprep.subr.bf16.mxu0 %v2895_v31 }
 0x11d   :  { %2574 = vmatpush3.bf16.msra.mxu1 %v2893_v29 }
 0x11e   :  { %2575 = vmatprep.subr.bf16.mxu1 %v2894_v30 }
 0x121   :  { %2576 = vmatpush3.bf16.msra.mxu1 %v2894_v30 }
 0x1cd   :  { %v2515_v34 = vpop.f32.mrb[16].mxu0 }
 0x1ce   :  { %v374_v35 = vadd.f32 %v2515_v34, %v282_v33  ;;  %v365_v36 = vpop.f32.mrb[17].mxu0  ;;  %v2896_v34 = vld [vmem:[#allocation2 + $0xc8] sm:$0xff]  }
 0x1cf   :  { %v366_v37 = vadd.f32 %v365_v36, %v282_v33  ;;  %v2516_v38 = vpop.f32.mrb[18].mxu0  ;;  %v2899_v36 = vld [vmem:[#allocation2 + $0xe0] sm:$0xff]  }
 0x1d0   :  { %v377_v39 = vadd.f32 %v2516_v38, %v282_v33  ;;  %v368_v40 = vpop.f32.mrb[19].mxu0  ;;  %v430_v42 = vmax.f32 %v374_v35, 0.0  ;;  %v2898_v35 = vld [vmem:[#allocation2 + $0xd8] sm:$0xff]   ;;  %v471_v38 = vsub.s32 2, %v3094_v20 }
 0x1d1   :  { %v369_v41 = vadd.f32 %v368_v40, %v282_v33  ;;  %v428_v44 = vmax.f32 %v366_v37, 0.0  ;;  %v2900_v37 = vld [vmem:[#allocation2 + $0xe8] sm:$0xff]  }
 0x1d2   :  { %v431_v43 = vmax.f32 %v377_v39, 0.0  ;;  %v472_v39 = vrot.slane %v3100_v22, %v471_v38 }
 0x1d3   :  { %v429_v45 = vmax.f32 %v369_v41, 0.0 }
 0x1d4   :  { %v462_v46 = vpack.c.bf16 %v431_v43, %v430_v42 }
 0x1d5   :  { %v461_v47 = vpack.c.bf16 %v429_v45, %v428_v44  ;;  %v2519_v48 = vpop.f32.mrb[20].mxu0 }
 0x1d6   :  { %v390_v49 = vadd.f32 %v2519_v48, %v282_v33  ;;  %v381_v50 = vpop.f32.mrb[21].mxu0 }
 0x1d7   :  { %v382_v51 = vadd.f32 %v381_v50, %v282_v33  ;;  %v2520_v52 = vpop.f32.mrb[22].mxu0  ;;  %2545 = vmatprep.mubr.bf16.mxu0 %v461_v47 }
 0x1d8   :  { %v393_v53 = vadd.f32 %v2520_v52, %v282_v33  ;;  %v384_v54 = vpop.f32.mrb[23].mxu0  ;;  %2546 = vmatmul.mubr.bf16.vlgmr.msra.gmra.mrb[32].mxu0 %v462_v46  ;;  %v434_v56 = vmax.f32 %v390_v49, 0.0 }
 0x1d9   :  { %v385_v55 = vadd.f32 %v384_v54, %v282_v33  ;;  %v432_v58 = vmax.f32 %v382_v51, 0.0  ;;  %2594 = vmatpush3.bf16.msra.mxu0 %v2895_v31 }
 0x1da   :  { %v435_v57 = vmax.f32 %v393_v53, 0.0  ;;  %2595 = vmatprep.subr.bf16.mxu0 %v2896_v34 }
 0x1db   :  { %v433_v59 = vmax.f32 %v385_v55, 0.0 }
 0x1dc   :  { %v464_v60 = vpack.c.bf16 %v435_v57, %v434_v56 }
 0x1dd   :  { %v463_v61 = vpack.c.bf16 %v433_v59, %v432_v58  ;;  %v2523_v62 = vpop.f32.mrb[24].mxu0  ;;  %2596 = vmatpush3.bf16.msra.mxu0 %v2896_v34 }
 0x1de   :  { %v406_v63 = vadd.f32 %v2523_v62, %v282_v33  ;;  %v397_v0 = vpop.f32.mrb[25].mxu0 }
 0x1df   :  { %v398_v1 = vadd.f32 %v397_v0, %v282_v33  ;;  %v2524_v2 = vpop.f32.mrb[26].mxu0  ;;  %2549 = vmatprep.mubr.bf16.mxu0 %v463_v61 }
 0x1e0   :  { %v409_v3 = vadd.f32 %v2524_v2, %v282_v33  ;;  %v400_v4 = vpop.f32.mrb[27].mxu0  ;;  %2550 = vmatmul.mubr.bf16.gmra.mrb[36].mxu0 %v464_v60  ;;  %v438_v6 = vmax.f32 %v406_v63, 0.0 }
 0x1e1   :  { %v401_v5 = vadd.f32 %v400_v4, %v282_v33  ;;  %v436_v8 = vmax.f32 %v398_v1, 0.0 }
 0x1e2   :  { %v439_v7 = vmax.f32 %v409_v3, 0.0 }
 0x1e3   :  { %v437_v9 = vmax.f32 %v401_v5, 0.0 }
 0x1e4   :  { %v466_v10 = vpack.c.bf16 %v439_v7, %v438_v6 }
 0x1e5   :  { %v465_v11 = vpack.c.bf16 %v437_v9, %v436_v8  ;;  %v2527_v12 = vpop.f32.mrb[28].mxu0 }
 0x1e6   :  { %v422_v13 = vadd.f32 %v2527_v12, %v282_v33  ;;  %v413_v14 = vpop.f32.mrb[29].mxu0 }
 0x1e7   :  { %v414_v15 = vadd.f32 %v413_v14, %v282_v33  ;;  %v2528_v16 = vpop.f32.mrb[30].mxu0  ;;  %2553 = vmatprep.mubr.bf16.mxu0 %v465_v11 }
 0x1e8   :  { %v425_v17 = vadd.f32 %v2528_v16, %v282_v33  ;;  %v416_v18 = vpop.f32.mrb[31].mxu0  ;;  %2554 = vmatmul.mubr.bf16.gmra.mrb[40].mxu0 %v466_v10  ;;  %v442_v24 = vmax.f32 %v422_v13, 0.0 }
 0x1e9   :  { %v417_v19 = vadd.f32 %v416_v18, %v282_v33  ;;  %v440_v26 = vmax.f32 %v414_v15, 0.0  ;;  %v2897_v33 = vld [vmem:[#allocation2 + $0xd0] sm:$0xff]  }
 0x1ea   :  { %v443_v25 = vmax.f32 %v425_v17, 0.0  ;;  %2597 = vmatprep.subr.bf16.mxu0 %v2897_v33 }
 0x1eb   :  { %v441_v27 = vmax.f32 %v417_v19, 0.0  ;;  %2598 = vmatpush3.bf16.msra.mxu0 %v2897_v33 }
 0x1ec   :  { %v468_v28 = vpack.c.bf16 %v443_v25, %v442_v24  ;;  %2599 = vmatprep.subr.bf16.mxu0 %v2898_v35 }
 0x1ed   :  { %v467_v23 = vpack.c.bf16 %v441_v27, %v440_v26 }
 0x1ef   :  { %2557 = vmatprep.mubr.bf16.mxu0 %v467_v23  ;;  %2600 = vmatpush3.bf16.msra.mxu0 %v2898_v35 }
 0x1f0   :  { %2558 = vmatmul.mubr.bf16.gmra.mrb[44].mxu0 %v468_v28  ;;  %2601 = vmatprep.subr.bf16.mxu0 %v2899_v36 }
 0x1f3   :  { %2602 = vmatpush3.bf16.msra.mxu0 %v2899_v36  ;;  %v2901_v36 = vld [vmem:[#allocation2 + $0xf0] sm:$0xff]  }
 0x1f4   :  { %2603 = vmatprep.subr.bf16.mxu0 %v2900_v37 }
 0x1f7   :  { %2604 = vmatpush3.bf16.msra.mxu0 %v2900_v37  ;;  %v2902_v37 = vld [vmem:[#allocation2 + $0xf8] sm:$0xff]  }
 0x1f8   :  { %2605 = vmatprep.subr.bf16.mxu0 %v2901_v36 }
 0x1fb   :  { %2606 = vmatpush3.bf16.msra.mxu0 %v2901_v36 }
 0x1fc   :  { %2607 = vmatprep.subr.bf16.mxu0 %v2902_v37 }
 0x1ff   :  { %2608 = vmatpush3.bf16.msra.mxu0 %v2902_v37 }
 0x2ab   :  { %v2547_v40 = vpop.f32.mrb[32].mxu0 }
 0x2ac   :  { %v564_v41 = vadd.f32 %v2547_v40, %v472_v39  ;;  %v555_v42 = vpop.f32.mrb[33].mxu0  ;;  %v2903_v40 = vld [vmem:[%s3288_s3] sm:$0xff]  }
 0x2ad   :  { %v556_v43 = vadd.f32 %v555_v42, %v472_v39  ;;  %v2548_v44 = vpop.f32.mrb[34].mxu0  ;;  %2657 = vmatprep.subr.bf16.mxu0 %v2903_v40  ;;  %v2916_v42 = vld [vmem:[#allocation2 + $0x110] sm:$0xff]  }
 0x2ae   :  { %v567_v45 = vadd.f32 %v2548_v44, %v472_v39  ;;  %v558_v46 = vpop.f32.mrb[35].mxu0  ;;  %v620_v48 = vmax.f32 %v564_v41, 0.0  ;;  %v2915_v41 = vld [vmem:[#allocation2 + $0x108] sm:$0xff]   ;;  %v2918_v44 = vld [vmem:[#allocation2 + $0x120] sm:$0xff]  }
 0x2af   :  { %v559_v47 = vadd.f32 %v558_v46, %v472_v39  ;;  %v618_v50 = vmax.f32 %v556_v43, 0.0  ;;  %v2917_v43 = vld [vmem:[#allocation2 + $0x118] sm:$0xff]   ;;  %v661_v46 = vsub.s32 3, %v3094_v20 }
 0x2b0   :  { %v621_v49 = vmax.f32 %v567_v45, 0.0  ;;  %v2919_v45 = vld [vmem:[#allocation2 + $0x128] sm:$0xff]  }
 0x2b1   :  { %v619_v51 = vmax.f32 %v559_v47, 0.0  ;;  %v3136_v47 = vrot.slane %v3100_v22, %v661_v46 }
 0x2b2   :  { %v652_v52 = vpack.c.bf16 %v621_v49, %v620_v48 }
 0x2b3   :  { %v2551_v53 = vpop.f32.mrb[36].mxu0  ;;  %v651_v54 = vpack.c.bf16 %v619_v51, %v618_v50 }
 0x2b4   :  { %v580_v55 = vadd.f32 %v2551_v53, %v472_v39  ;;  %v571_v56 = vpop.f32.mrb[37].mxu0 }
 0x2b5   :  { %v572_v57 = vadd.f32 %v571_v56, %v472_v39  ;;  %v2552_v58 = vpop.f32.mrb[38].mxu0  ;;  %2577 = vmatprep.mubr.bf16.mxu1 %v651_v54 }
 0x2b6   :  { %v583_v59 = vadd.f32 %v2552_v58, %v472_v39  ;;  %v574_v60 = vpop.f32.mrb[39].mxu0  ;;  %2578 = vmatmul.mubr.bf16.vlgmr.msra.gmra.mrb[0].mxu1 %v652_v52  ;;  %v624_v62 = vmax.f32 %v580_v55, 0.0 }
 0x2b7   :  { %v575_v61 = vadd.f32 %v574_v60, %v472_v39  ;;  %v622_v0 = vmax.f32 %v572_v57, 0.0 }
 0x2b8   :  { %v625_v63 = vmax.f32 %v583_v59, 0.0 }
 0x2b9   :  { %v623_v1 = vmax.f32 %v575_v61, 0.0 }
 0x2ba   :  { %v654_v2 = vpack.c.bf16 %v625_v63, %v624_v62 }
 0x2bb   :  { %v653_v3 = vpack.c.bf16 %v623_v1, %v622_v0  ;;  %v2555_v4 = vpop.f32.mrb[40].mxu0  ;;  %v2904_v1 = vld [vmem:[%s3288_s3 + $0x8] sm:$0xff]  }
 0x2bc   :  { %v596_v5 = vadd.f32 %v2555_v4, %v472_v39  ;;  %v587_v6 = vpop.f32.mrb[41].mxu0 }
 0x2bd   :  { %v588_v7 = vadd.f32 %v587_v6, %v472_v39  ;;  %v2556_v8 = vpop.f32.mrb[42].mxu0  ;;  %2581 = vmatprep.mubr.bf16.mxu1 %v653_v3 }
 0x2be   :  { %v599_v9 = vadd.f32 %v2556_v8, %v472_v39  ;;  %v590_v10 = vpop.f32.mrb[43].mxu0  ;;  %2582 = vmatmul.mubr.bf16.gmra.mrb[4].mxu1 %v654_v2  ;;  %v628_v12 = vmax.f32 %v596_v5, 0.0 }
 0x2bf   :  { %v591_v11 = vadd.f32 %v590_v10, %v472_v39  ;;  %v626_v14 = vmax.f32 %v588_v7, 0.0 }
 0x2c0   :  { %v629_v13 = vmax.f32 %v599_v9, 0.0  ;;  %v2905_v9 = vld [vmem:[%s3288_s3 + $0x10] sm:$0xff]  }
 0x2c1   :  { %v627_v15 = vmax.f32 %v591_v11, 0.0 }
 0x2c2   :  { %v656_v16 = vpack.c.bf16 %v629_v13, %v628_v12 }
 0x2c3   :  { %v655_v17 = vpack.c.bf16 %v627_v15, %v626_v14  ;;  %v2559_v18 = vpop.f32.mrb[44].mxu0 }
 0x2c4   :  { %v612_v19 = vadd.f32 %v2559_v18, %v472_v39  ;;  %v603_v24 = vpop.f32.mrb[45].mxu0 }
 0x2c5   :  { %v604_v25 = vadd.f32 %v603_v24, %v472_v39  ;;  %v2560_v26 = vpop.f32.mrb[46].mxu0  ;;  %2585 = vmatprep.mubr.bf16.mxu1 %v655_v17 }
 0x2c6   :  { %v615_v27 = vadd.f32 %v2560_v26, %v472_v39  ;;  %v606_v28 = vpop.f32.mrb[47].mxu0  ;;  %2586 = vmatmul.mubr.bf16.gmra.mrb[8].mxu1 %v656_v16  ;;  %v632_v29 = vmax.f32 %v612_v19, 0.0 }
 0x2c7   :  { %v607_v23 = vadd.f32 %v606_v28, %v472_v39  ;;  %v630_v31 = vmax.f32 %v604_v25, 0.0  ;;  %v2914_v39 = vld [vmem:[#allocation2 + $0x100] sm:$0xff]  }
 0x2c8   :  { %v633_v30 = vmax.f32 %v615_v27, 0.0  ;;  %2625 = vmatprep.subr.bf16.mxu1 %v2914_v39 }
 0x2c9   :  { %v631_v34 = vmax.f32 %v607_v23, 0.0  ;;  %2626 = vmatpush3.bf16.msra.mxu1 %v2914_v39 }
 0x2ca   :  { %v658_v33 = vpack.c.bf16 %v633_v30, %v632_v29  ;;  %2627 = vmatprep.subr.bf16.mxu1 %v2915_v41 }
 0x2cb   :  { %v657_v35 = vpack.c.bf16 %v631_v34, %v630_v31 }
 0x2cd   :  { %2589 = vmatprep.mubr.bf16.mxu1 %v657_v35  ;;  %2628 = vmatpush3.bf16.msra.mxu1 %v2915_v41 }
 0x2ce   :  { %2590 = vmatmul.mubr.bf16.gmra.mrb[12].mxu1 %v658_v33  ;;  %2629 = vmatprep.subr.bf16.mxu1 %v2916_v42 }
 0x2d1   :  { %2630 = vmatpush3.bf16.msra.mxu1 %v2916_v42 }
 0x2d2   :  { %2631 = vmatprep.subr.bf16.mxu1 %v2917_v43 }
 0x2d5   :  { %2632 = vmatpush3.bf16.msra.mxu1 %v2917_v43 }
 0x2d6   :  { %2633 = vmatprep.subr.bf16.mxu1 %v2918_v44 }
 0x2d9   :  { %2634 = vmatpush3.bf16.msra.mxu1 %v2918_v44 }
 0x2da   :  { %2635 = vmatprep.subr.bf16.mxu1 %v2919_v45 }
 0x2dd   :  { %2636 = vmatpush3.bf16.msra.mxu1 %v2919_v45 }
 0x389   :  { %v2579_v48 = vpop.f32.mrb[0].mxu1 }
 0x38a   :  { %v754_v49 = vadd.f32 %v2579_v48, %v3136_v47  ;;  %v745_v50 = vpop.f32.mrb[1].mxu1  ;;  %v2906_v48 = vld [vmem:[%s3286_s1] sm:$0xff]  }
 0x38b   :  { %v746_v51 = vadd.f32 %v745_v50, %v3136_v47  ;;  %v2580_v52 = vpop.f32.mrb[2].mxu1  ;;  %v2909_v50 = vld [vmem:[%s3286_s1 + $0x18] sm:$0xff]  }
 0x38c   :  { %v757_v53 = vadd.f32 %v2580_v52, %v3136_v47  ;;  %v748_v54 = vpop.f32.mrb[3].mxu1  ;;  %v810_v56 = vmax.f32 %v754_v49, 0.0  ;;  %v2907_v49 = vld [vmem:[%s3286_s1 + $0x8] sm:$0xff]  }
 0x38d   :  { %v749_v55 = vadd.f32 %v748_v54, %v3136_v47  ;;  %v808_v58 = vmax.f32 %v746_v51, 0.0  ;;  %v2910_v51 = vld [vmem:[%s3286_s1 + $0x20] sm:$0xff]   ;;  %v2911_v52 = vld [vmem:[%s3286_s1 + $0x28] sm:$0xff]   ;;  %v2913_v54 = vld [vmem:[%s3286_s1 + $0x38] sm:$0xff]  }
 0x38e   :  { %v811_v57 = vmax.f32 %v757_v53, 0.0  ;;  %v2912_v53 = vld [vmem:[%s3286_s1 + $0x30] sm:$0xff]  }
 0x38f   :  { %v809_v59 = vmax.f32 %v749_v55, 0.0  ;;  %v2920_v55 = vld [vmem:[#allocation2 + $0x130] sm:$0xff]  }
 0x390   :  { %v842_v60 = vpack.c.bf16 %v811_v57, %v810_v56  ;;  %2637 = vmatprep.subr.bf16.mxu1 %v2920_v55  ;;  %v2921_v56 = vld [vmem:[#allocation2 + $0x138] sm:$0xff]   ;;  %v2922_v57 = vld [vmem:[#allocation2 + $0x140] sm:$0xff]  }
 0x391   :  { %v841_v61 = vpack.c.bf16 %v809_v59, %v808_v58  ;;  %v2583_v62 = vpop.f32.mrb[4].mxu1  ;;  %2638 = vmatpush3.bf16.msra.mxu1 %v2920_v55  ;;  %v2930_v58 = vld [vmem:[#allocation2 + $0x180] sm:$0xff]   ;;  %v2931_v59 = vld [vmem:[#allocation2 + $0x188] sm:$0xff]  }
 0x392   :  { %v770_v63 = vadd.f32 %v2583_v62, %v3136_v47  ;;  %v761_v0 = vpop.f32.mrb[5].mxu1  ;;  %2639 = vmatprep.subr.bf16.mxu1 %v2921_v56  ;;  %v2934_v62 = vld [vmem:[#allocation2 + $0x1a0] sm:$0xff]  }
 0x393   :  { %v762_v2 = vadd.f32 %v761_v0, %v3136_v47  ;;  %v2584_v3 = vpop.f32.mrb[6].mxu1  ;;  %2609 = vmatprep.mubr.bf16.mxu0 %v841_v61  ;;  %v2933_v61 = vld [vmem:[#allocation2 + $0x198] sm:$0xff]   ;;  %v851_v0 = vsub.s32 4, %v3094_v20 }
 0x394   :  { %v773_v4 = vadd.f32 %v2584_v3, %v3136_v47  ;;  %v764_v5 = vpop.f32.mrb[7].mxu1  ;;  %2610 = vmatmul.mubr.bf16.vlgmr.msra.gmra.mrb[48].mxu0 %v842_v60  ;;  %v814_v7 = vmax.f32 %v770_v63, 0.0  ;;  %v2932_v60 = vld [vmem:[#allocation2 + $0x190] sm:$0xff]   ;;  %v2935_v63 = vld [vmem:[#allocation2 + $0x1a8] sm:$0xff]  }
 0x395   :  { %v765_v6 = vadd.f32 %v764_v5, %v3136_v47  ;;  %2658 = vmatpush3.bf16.msra.mxu0 %v2903_v40  ;;  %v812_v10 = vmax.f32 %v762_v2, 0.0  ;;  %2640 = vmatpush3.bf16.msra.mxu1 %v2921_v56  ;;  %v2927_v56 = vld [vmem:[#allocation2 + $0x168] sm:$0xff]  }
 0x396   :  { %v815_v8 = vmax.f32 %v773_v4, 0.0  ;;  %2659 = vmatprep.subr.bf16.mxu0 %v2904_v1  ;;  %2679 = vmatprep.subr.bf16.mxu1 %v2922_v57 }
 0x397   :  { %v813_v11 = vmax.f32 %v765_v6, 0.0 }
 0x398   :  { %v844_v12 = vpack.c.bf16 %v815_v8, %v814_v7 }
 0x399   :  { %v843_v13 = vpack.c.bf16 %v813_v11, %v812_v10  ;;  %v2587_v14 = vpop.f32.mrb[8].mxu1  ;;  %2660 = vmatpush3.bf16.msra.mxu0 %v2904_v1  ;;  %v3194_v1 = vrot.slane %v3100_v22, %v851_v0 }
 0x39a   :  { %v786_v15 = vadd.f32 %v2587_v14, %v3136_v47  ;;  %v777_v16 = vpop.f32.mrb[9].mxu1  ;;  %2661 = vmatprep.subr.bf16.mxu0 %v2905_v9 }
 0x39b   :  { %v778_v17 = vadd.f32 %v777_v16, %v3136_v47  ;;  %v2588_v18 = vpop.f32.mrb[10].mxu1  ;;  %2613 = vmatprep.mubr.bf16.mxu0 %v843_v13 }
 0x39c   :  { %v789_v19 = vadd.f32 %v2588_v18, %v3136_v47  ;;  %v780_v24 = vpop.f32.mrb[11].mxu1  ;;  %2614 = vmatmul.mubr.bf16.gmra.mrb[52].mxu0 %v844_v12  ;;  %v818_v26 = vmax.f32 %v786_v15, 0.0 }
 0x39d   :  { %v781_v25 = vadd.f32 %v780_v24, %v3136_v47  ;;  %2662 = vmatpush3.bf16.msra.mxu0 %v2905_v9  ;;  %v816_v28 = vmax.f32 %v778_v17, 0.0 }
 0x39e   :  { %v819_v27 = vmax.f32 %v789_v19, 0.0  ;;  %2711 = vmatprep.subr.bf16.mxu0 %v2930_v58  ;;  %v2923_v19 = vld [vmem:[#allocation2 + $0x148] sm:$0xff]  }
 0x39f   :  { %v817_v23 = vmax.f32 %v781_v25, 0.0 }
 0x3a0   :  { %v846_v29 = vpack.c.bf16 %v819_v27, %v818_v26 }
 0x3a1   :  { %v845_v30 = vpack.c.bf16 %v817_v23, %v816_v28  ;;  %v2591_v31 = vpop.f32.mrb[12].mxu1 }
 0x3a2   :  { %v802_v34 = vadd.f32 %v2591_v31, %v3136_v47  ;;  %v793_v33 = vpop.f32.mrb[13].mxu1 }
 0x3a3   :  { %v794_v35 = vadd.f32 %v793_v33, %v3136_v47  ;;  %v2592_v36 = vpop.f32.mrb[14].mxu1  ;;  %2617 = vmatprep.mubr.bf16.mxu0 %v845_v30  ;;  %v2924_v30 = vld [vmem:[#allocation2 + $0x150] sm:$0xff]  }
 0x3a4   :  { %v805_v37 = vadd.f32 %v2592_v36, %v3136_v47  ;;  %v796_v40 = vpop.f32.mrb[15].mxu1  ;;  %2618 = vmatmul.mubr.bf16.gmra.mrb[56].mxu0 %v846_v29  ;;  %v822_v41 = vmax.f32 %v802_v34, 0.0 }
 0x3a5   :  { %v797_v39 = vadd.f32 %v796_v40, %v3136_v47  ;;  %v820_v43 = vmax.f32 %v794_v35, 0.0  ;;  %v2908_v47 = vld [vmem:[%s3286_s1 + $0x10] sm:$0xff]  }
 0x3a6   :  { %v823_v42 = vmax.f32 %v805_v37, 0.0 }
 0x3a7   :  { %v821_v44 = vmax.f32 %v797_v39, 0.0  ;;  %v2925_v39 = vld [vmem:[#allocation2 + $0x158] sm:$0xff]  }
 0x3a8   :  { %v848_v45 = vpack.c.bf16 %v823_v42, %v822_v41 }
 0x3a9   :  { %v847_v46 = vpack.c.bf16 %v821_v44, %v820_v43 }
 0x3ab   :  { %2621 = vmatprep.mubr.bf16.mxu0 %v847_v46 }
 0x3ac   :  { %2622 = vmatmul.mubr.bf16.gmra.mrb[60].mxu0 %v848_v45 }
 0x3ad   :  { %2663 = vmatprep.mubr.msk.bf16.mxu0 %vm1272_vm1, %v2906_v48 }
 0x3b4   :  { %2664 = vmatmul.mubr.msk.bf16.vlgmr.msra.gmra.mrb[64].mxu0 %vm1272_vm1, %v2907_v49  ;;  %v2926_v49 = vld [vmem:[#allocation2 + $0x160] sm:$0xff]  }
 0x3b5   :  { %2667 = vmatprep.mubr.msk.bf16.mxu0 %vm1272_vm1, %v2908_v47  ;;  %2712 = vmatpush3.bf16.msra.mxu0 %v2930_v58 }
 0x3b6   :  { %2713 = vmatprep.subr.bf16.mxu0 %v2931_v59 }
 0x3b9   :  { %2714 = vmatpush3.bf16.msra.mxu0 %v2931_v59 }
 0x3ba   :  { %2715 = vmatprep.subr.bf16.mxu0 %v2932_v60 }
 0x3bc   :  { %2668 = vmatmul.mubr.msk.bf16.gmra.mrb[68].mxu0 %vm1272_vm1, %v2909_v50 }
 0x3bd   :  { %2671 = vmatprep.mubr.msk.bf16.mxu0 %vm1272_vm1, %v2910_v51  ;;  %2716 = vmatpush3.bf16.msra.mxu0 %v2932_v60 }
 0x3be   :  { %2717 = vmatprep.subr.bf16.mxu0 %v2933_v61 }
 0x3c1   :  { %2718 = vmatpush3.bf16.msra.mxu0 %v2933_v61 }
 0x3c2   :  { %2719 = vmatprep.subr.bf16.mxu0 %v2934_v62 }
 0x3c4   :  { %2672 = vmatmul.mubr.msk.bf16.gmra.mrb[72].mxu0 %vm1272_vm1, %v2911_v52 }
 0x3c5   :  { %2675 = vmatprep.mubr.msk.bf16.mxu0 %vm1272_vm1, %v2912_v53  ;;  %2720 = vmatpush3.bf16.msra.mxu0 %v2934_v62 }
 0x3c6   :  { %2721 = vmatprep.subr.bf16.mxu0 %v2935_v63 }
 0x3c9   :  { %2722 = vmatpush3.bf16.msra.mxu0 %v2935_v63 }
 0x3cc   :  { %2676 = vmatmul.mubr.msk.bf16.gmra.mrb[76].mxu0 %vm1272_vm1, %v2913_v54 }
 0x467   :  { %v2611_v2 = vpop.f32.mrb[48].mxu0 }
 0x468   :  { %v944_v3 = vadd.f32 %v2611_v2, %v3194_v1  ;;  %v935_v4 = vpop.f32.mrb[49].mxu0 }
 0x469   :  { %v936_v5 = vadd.f32 %v935_v4, %v3194_v1  ;;  %v2612_v6 = vpop.f32.mrb[50].mxu0 }
 0x46a   :  { %v947_v7 = vadd.f32 %v2612_v6, %v3194_v1  ;;  %v938_v8 = vpop.f32.mrb[51].mxu0  ;;  %v1000_v10 = vmax.f32 %v944_v3, 0.0  ;;  %v2928_v3 = vld [vmem:[#allocation2 + $0x170] sm:$0xff]  }
 0x46b   :  { %v939_v9 = vadd.f32 %v938_v8, %v3194_v1  ;;  %v998_v12 = vmax.f32 %v936_v5, 0.0 }
 0x46c   :  { %v1001_v11 = vmax.f32 %v947_v7, 0.0 }
 0x46d   :  { %v999_v13 = vmax.f32 %v939_v9, 0.0 }
 0x46e   :  { %v1032_v14 = vpack.c.bf16 %v1001_v11, %v1000_v10  ;;  %v2929_v11 = vld [vmem:[#allocation2 + $0x178] sm:$0xff]  }
 0x46f   :  { %v1031_v15 = vpack.c.bf16 %v999_v13, %v998_v12  ;;  %v2615_v16 = vpop.f32.mrb[52].mxu0 }
 0x470   :  { %v960_v17 = vadd.f32 %v2615_v16, %v3194_v1  ;;  %v951_v18 = vpop.f32.mrb[53].mxu0 }
 0x471   :  { %v952_v24 = vadd.f32 %v951_v18, %v3194_v1  ;;  %v2616_v25 = vpop.f32.mrb[54].mxu0  ;;  %2641 = vmatprep.mubr.bf16.mxu1 %v1031_v15 }
 0x472   :  { %v963_v26 = vadd.f32 %v2616_v25, %v3194_v1  ;;  %v954_v27 = vpop.f32.mrb[55].mxu0  ;;  %2642 = vmatmul.mubr.bf16.vlgmr.msra.gmra.mrb[16].mxu1 %v1032_v14  ;;  %v1004_v23 = vmax.f32 %v960_v17, 0.0 }
 0x473   :  { %v955_v28 = vadd.f32 %v954_v27, %v3194_v1  ;;  %2680 = vmatpush3.bf16.msra.mxu1 %v2922_v57  ;;  %v1002_v31 = vmax.f32 %v952_v24, 0.0  ;;  %v1212_v57 = vsub.s32 6, %v3094_v20 }
 0x474   :  { %v1005_v29 = vmax.f32 %v963_v26, 0.0  ;;  %2681 = vmatprep.subr.bf16.mxu1 %v2923_v19 }
 0x475   :  { %v1003_v34 = vmax.f32 %v955_v28, 0.0  ;;  %v3214_v2 = vrot.slane %v3100_v22, %v1212_v57 }
 0x476   :  { %v1034_v33 = vpack.c.bf16 %v1005_v29, %v1004_v23 }
 0x477   :  { %v1033_v35 = vpack.c.bf16 %v1003_v34, %v1002_v31  ;;  %2682 = vmatpush3.bf16.msra.mxu1 %v2923_v19  ;;  %v2619_v36 = vpop.f32.mrb[56].mxu0 }
 0x478   :  { %v976_v37 = vadd.f32 %v2619_v36, %v3194_v1  ;;  %v967_v40 = vpop.f32.mrb[57].mxu0  ;;  %2683 = vmatprep.subr.bf16.mxu1 %v2924_v30 }
 0x479   :  { %v968_v41 = vadd.f32 %v967_v40, %v3194_v1  ;;  %v2620_v42 = vpop.f32.mrb[58].mxu0  ;;  %2645 = vmatprep.mubr.bf16.mxu1 %v1033_v35 }
 0x47a   :  { %v979_v43 = vadd.f32 %v2620_v42, %v3194_v1  ;;  %v970_v44 = vpop.f32.mrb[59].mxu0  ;;  %2646 = vmatmul.mubr.bf16.gmra.mrb[20].mxu1 %v1034_v33  ;;  %v1008_v46 = vmax.f32 %v976_v37, 0.0 }
 0x47b   :  { %v971_v45 = vadd.f32 %v970_v44, %v3194_v1  ;;  %2684 = vmatpush3.bf16.msra.mxu1 %v2924_v30  ;;  %v1006_v47 = vmax.f32 %v968_v41, 0.0 }
 0x47c   :  { %v1009_v48 = vmax.f32 %v979_v43, 0.0  ;;  %2685 = vmatprep.subr.bf16.mxu1 %v2925_v39 }
 0x47d   :  { %v1007_v50 = vmax.f32 %v971_v45, 0.0 }
 0x47e   :  { %v1036_v51 = vpack.c.bf16 %v1009_v48, %v1008_v46 }
 0x47f   :  { %v1035_v52 = vpack.c.bf16 %v1007_v50, %v1006_v47  ;;  %2686 = vmatpush3.bf16.msra.mxu1 %v2925_v39  ;;  %v2623_v53 = vpop.f32.mrb[60].mxu0 }
 0x480   :  { %v992_v54 = vadd.f32 %v2623_v53, %v3194_v1  ;;  %v983_v55 = vpop.f32.mrb[61].mxu0  ;;  %2687 = vmatprep.subr.bf16.mxu1 %v2926_v49 }
 0x481   :  { %v984_v58 = vadd.f32 %v983_v55, %v3194_v1  ;;  %v2624_v59 = vpop.f32.mrb[62].mxu0  ;;  %2649 = vmatprep.mubr.bf16.mxu1 %v1035_v52 }
 0x482   :  { %v995_v60 = vadd.f32 %v2624_v59, %v3194_v1  ;;  %v986_v61 = vpop.f32.mrb[63].mxu0  ;;  %2650 = vmatmul.mubr.bf16.gmra.mrb[24].mxu1 %v1036_v51  ;;  %v1012_v63 = vmax.f32 %v992_v54, 0.0 }
 0x483   :  { %v987_v62 = vadd.f32 %v986_v61, %v3194_v1  ;;  %2688 = vmatpush3.bf16.msra.mxu1 %v2926_v49  ;;  %v1010_v4 = vmax.f32 %v984_v58, 0.0 }
 0x484   :  { %v1013_v0 = vmax.f32 %v995_v60, 0.0  ;;  %2689 = vmatprep.subr.bf16.mxu1 %v2927_v56 }
 0x485   :  { %v1011_v5 = vmax.f32 %v987_v62, 0.0 }
 0x486   :  { %v1038_v6 = vpack.c.bf16 %v1013_v0, %v1012_v63 }
 0x487   :  { %v1037_v7 = vpack.c.bf16 %v1011_v5, %v1010_v4  ;;  %2690 = vmatpush3.bf16.msra.mxu1 %v2927_v56  ;;  %v2665_v8 = vpop.f32.mrb[64].mxu0 }
 0x488   :  { %v1340_v9 = vadd.f32 %v2665_v8, %v3214_v2  ;;  %v1331_v10 = vpop.f32.mrb[65].mxu0  ;;  %2691 = vmatprep.subr.bf16.mxu1 %v2928_v3  ;;  %v2938_v8 = vld [vmem:[#allocation2 + $0x1c0] sm:$0xff]  }
 0x489   :  { %v1332_v1 = vadd.f32 %v1331_v10, %v3214_v2  ;;  %2653 = vmatprep.mubr.bf16.mxu1 %v1037_v7  ;;  %v2666_v12 = vpop.f32.mrb[66].mxu0  ;;  %v2937_v7 = vld [vmem:[#allocation2 + $0x1b8] sm:$0xff]  }
 0x48a   :  { %v1343_v13 = vadd.f32 %v2666_v12, %v3214_v2  ;;  %2654 = vmatmul.mubr.bf16.gmra.mrb[28].mxu1 %v1038_v6  ;;  %v1334_v22 = vpop.f32.mrb[67].mxu0  ;;  %v1396_v15 = vmax.f32 %v1340_v9, 0.0  ;;  %v2936_v6 = vld [vmem:[#allocation2 + $0x1b0] sm:$0xff]   ;;  %v2939_v9 = vld [vmem:[#allocation2 + $0x1c8] sm:$0xff]   ;;  %v2941_v10 = vld [vmem:[#allocation2 + $0x1d8] sm:$0xff]   ;;  %v1437_v12 = vsub.s32 7, %v3094_v20 }
 0x48b   :  { %v1335_v14 = vadd.f32 %v1334_v22, %v3214_v2  ;;  %2692 = vmatpush3.bf16.msra.mxu1 %v2928_v3  ;;  %v1394_v17 = vmax.f32 %v1332_v1, 0.0  ;;  %2723 = vmatprep.subr.bf16.mxu0 %v2936_v6  ;;  %v2943_v1 = vld [vmem:[#allocation2 + $0x1e8] sm:$0xff]  }
 0x48c   :  { %v1397_v16 = vmax.f32 %v1343_v13, 0.0  ;;  %2693 = vmatprep.subr.bf16.mxu1 %v2929_v11  ;;  %2724 = vmatpush3.bf16.msra.mxu0 %v2936_v6  ;;  %v3236_v13 = vld [vmem:[%s3290_s5] sm:$0xff] }
 0x48d   :  { %v1395_v18 = vmax.f32 %v1335_v14, 0.0  ;;  %2725 = vmatprep.subr.bf16.mxu0 %v2937_v7  ;;  %v1438_v22 = vrot.slane %v3236_v13, %v1437_v12  ;;  %v2945_v12 = vld [vmem:[#allocation2 + $0x1f8] sm:$0xff]  }
 0x48e   :  { %v1428_v19 = vpack.c.bf16 %v1397_v16, %v1396_v15 }
 0x48f   :  { %v1427_v24 = vpack.c.bf16 %v1395_v18, %v1394_v17  ;;  %2694 = vmatpush3.bf16.msra.mxu1 %v2929_v11  ;;  %v2669_v25 = vpop.f32.mrb[68].mxu0  ;;  %v2942_v11 = vld [vmem:[#allocation2 + $0x1e0] sm:$0xff]  }
 0x490   :  { %v1356_v26 = vadd.f32 %v2669_v25, %v3214_v2  ;;  %v1347_v27 = vpop.f32.mrb[69].mxu0  ;;  %2726 = vmatpush3.bf16.msra.mxu0 %v2937_v7  ;;  %2743 = vmatprep.subr.bf16.mxu1 %v2938_v8 }
 0x491   :  { %v1348_v28 = vadd.f32 %v1347_v27, %v3214_v2  ;;  %v2670_v23 = vpop.f32.mrb[70].mxu0  ;;  %2695 = vmatprep.mubr.bf16.mxu1 %v1427_v24 }
 0x492   :  { %v1359_v29 = vadd.f32 %v2670_v23, %v3214_v2  ;;  %v1350_v30 = vpop.f32.mrb[71].mxu0  ;;  %2696 = vmatmul.mubr.bf16.vlgmr.msra.gmra.mrb[32].mxu1 %v1428_v19  ;;  %v1400_v34 = vmax.f32 %v1356_v26, 0.0 }
 0x493   :  { %v1351_v31 = vadd.f32 %v1350_v30, %v3214_v2  ;;  %v1398_v35 = vmax.f32 %v1348_v28, 0.0  ;;  %2744 = vmatpush3.bf16.msra.mxu1 %v2938_v8 }
 0x494   :  { %v1401_v33 = vmax.f32 %v1359_v29, 0.0  ;;  %2745 = vmatprep.subr.bf16.mxu1 %v2939_v9 }
 0x495   :  { %v1399_v36 = vmax.f32 %v1351_v31, 0.0 }
 0x496   :  { %v1430_v37 = vpack.c.bf16 %v1401_v33, %v1400_v34 }
 0x497   :  { %v1429_v40 = vpack.c.bf16 %v1399_v36, %v1398_v35  ;;  %v2673_v39 = vpop.f32.mrb[72].mxu0  ;;  %2746 = vmatpush3.bf16.msra.mxu1 %v2939_v9 }
 0x498   :  { %v1372_v41 = vadd.f32 %v2673_v39, %v3214_v2  ;;  %v1363_v42 = vpop.f32.mrb[73].mxu0 }
 0x499   :  { %v1364_v43 = vadd.f32 %v1363_v42, %v3214_v2  ;;  %v2674_v44 = vpop.f32.mrb[74].mxu0  ;;  %2699 = vmatprep.mubr.bf16.mxu1 %v1429_v40 }
 0x49a   :  { %v1375_v45 = vadd.f32 %v2674_v44, %v3214_v2  ;;  %v1366_v46 = vpop.f32.mrb[75].mxu0  ;;  %2700 = vmatmul.mubr.bf16.gmra.mrb[36].mxu1 %v1430_v37  ;;  %v1404_v49 = vmax.f32 %v1372_v41, 0.0 }
 0x49b   :  { %v1367_v48 = vadd.f32 %v1366_v46, %v3214_v2  ;;  %v1402_v50 = vmax.f32 %v1364_v43, 0.0 }
 0x49c   :  { %v1405_v47 = vmax.f32 %v1375_v45, 0.0 }
 0x49d   :  { %v1403_v51 = vmax.f32 %v1367_v48, 0.0 }
 0x49e   :  { %v1432_v52 = vpack.c.bf16 %v1405_v47, %v1404_v49 }
 0x49f   :  { %v1431_v53 = vpack.c.bf16 %v1403_v51, %v1402_v50  ;;  %v2677_v54 = vpop.f32.mrb[76].mxu0 }
 0x4a0   :  { %v1388_v55 = vadd.f32 %v2677_v54, %v3214_v2  ;;  %v1379_v56 = vpop.f32.mrb[77].mxu0 }
 0x4a1   :  { %v1380_v57 = vadd.f32 %v1379_v56, %v3214_v2  ;;  %v2678_v58 = vpop.f32.mrb[78].mxu0  ;;  %2703 = vmatprep.mubr.bf16.mxu1 %v1431_v53 }
 0x4a2   :  { %v1391_v59 = vadd.f32 %v2678_v58, %v3214_v2  ;;  %v1382_v60 = vpop.f32.mrb[79].mxu0  ;;  %2704 = vmatmul.mubr.bf16.gmra.mrb[40].mxu1 %v1432_v52  ;;  %v1408_v62 = vmax.f32 %v1388_v55, 0.0 }
 0x4a3   :  { %v1383_v61 = vadd.f32 %v1382_v60, %v3214_v2  ;;  %v1406_v0 = vmax.f32 %v1380_v57, 0.0  ;;  %v2940_v2 = vld [vmem:[#allocation2 + $0x1d0] sm:$0xff]  }
 0x4a4   :  { %v1409_v63 = vmax.f32 %v1391_v59, 0.0  ;;  %2747 = vmatprep.subr.bf16.mxu1 %v2940_v2 }
 0x4a5   :  { %v1407_v3 = vmax.f32 %v1383_v61, 0.0  ;;  %2748 = vmatpush3.bf16.msra.mxu1 %v2940_v2 }
 0x4a6   :  { %v1434_v4 = vpack.c.bf16 %v1409_v63, %v1408_v62  ;;  %2749 = vmatprep.subr.bf16.mxu1 %v2941_v10 }
 0x4a7   :  { %v1433_v5 = vpack.c.bf16 %v1407_v3, %v1406_v0 }
 0x4a9   :  { %2707 = vmatprep.mubr.bf16.mxu1 %v1433_v5  ;;  %2750 = vmatpush3.bf16.msra.mxu1 %v2941_v10 }
 0x4aa   :  { %2708 = vmatmul.mubr.bf16.gmra.mrb[44].mxu1 %v1434_v4  ;;  %2751 = vmatprep.subr.bf16.mxu1 %v2942_v11 }
 0x4ad   :  { %2752 = vmatpush3.bf16.msra.mxu1 %v2942_v11 }
 0x4ae   :  { %2753 = vmatprep.subr.bf16.mxu1 %v2943_v1 }
 0x4b1   :  { %2754 = vmatpush3.bf16.msra.mxu1 %v2943_v1  ;;  %v2944_v1 = vld [vmem:[#allocation2 + $0x1f0] sm:$0xff]  }
 0x4b2   :  { %2755 = vmatprep.subr.bf16.mxu1 %v2944_v1 }
 0x4b5   :  { %2756 = vmatpush3.bf16.msra.mxu1 %v2944_v1 }
 0x4b6   :  { %2757 = vmatprep.subr.bf16.mxu1 %v2945_v12 }
 0x4b9   :  { %2758 = vmatpush3.bf16.msra.mxu1 %v2945_v12 }
 0x565   :  { %v2697_v14 = vpop.f32.mrb[32].mxu1 }
 0x566   :  { %v1530_v15 = vadd.f32 %v2697_v14, %v1438_v22  ;;  %v1521_v16 = vpop.f32.mrb[33].mxu1  ;;  %v2946_v14 = vld [vmem:[#allocation2 + $0x200] sm:$0xff]  }
 0x567   :  { %v1522_v17 = vadd.f32 %v1521_v16, %v1438_v22  ;;  %v2698_v18 = vpop.f32.mrb[34].mxu1  ;;  %2775 = vmatprep.subr.bf16.mxu1 %v2946_v14 }
 0x568   :  { %v1533_v19 = vadd.f32 %v2698_v18, %v1438_v22  ;;  %v1524_v24 = vpop.f32.mrb[35].mxu1  ;;  %v1586_v26 = vmax.f32 %v1530_v15, 0.0 }
 0x569   :  { %v1525_v25 = vadd.f32 %v1524_v24, %v1438_v22  ;;  %v1584_v28 = vmax.f32 %v1522_v17, 0.0 }
 0x56a   :  { %v1587_v27 = vmax.f32 %v1533_v19, 0.0 }
 0x56b   :  { %v1585_v23 = vmax.f32 %v1525_v25, 0.0 }
 0x56c   :  { %v1618_v29 = vpack.c.bf16 %v1587_v27, %v1586_v26 }
 0x56d   :  { %v1617_v30 = vpack.c.bf16 %v1585_v23, %v1584_v28  ;;  %v2701_v31 = vpop.f32.mrb[36].mxu1 }
 0x56e   :  { %v1546_v34 = vadd.f32 %v2701_v31, %v1438_v22  ;;  %v1537_v33 = vpop.f32.mrb[37].mxu1 }
 0x56f   :  { %v1538_v35 = vadd.f32 %v1537_v33, %v1438_v22  ;;  %v2702_v36 = vpop.f32.mrb[38].mxu1  ;;  %2727 = vmatprep.mubr.bf16.mxu0 %v1617_v30 }
 0x570   :  { %v1549_v37 = vadd.f32 %v2702_v36, %v1438_v22  ;;  %v1540_v40 = vpop.f32.mrb[39].mxu1  ;;  %2728 = vmatmul.mubr.bf16.vlgmr.msra.gmra.mrb[80].mxu0 %v1618_v29  ;;  %v1590_v41 = vmax.f32 %v1546_v34, 0.0  ;;  %v2947_v36 = vld [vmem:[#allocation2 + $0x208] sm:$0xff]  }
 0x571   :  { %v1541_v39 = vadd.f32 %v1540_v40, %v1438_v22  ;;  %v1588_v43 = vmax.f32 %v1538_v35, 0.0 }
 0x572   :  { %v1591_v42 = vmax.f32 %v1549_v37, 0.0 }
 0x573   :  { %v1589_v44 = vmax.f32 %v1541_v39, 0.0 }
 0x574   :  { %v1620_v45 = vpack.c.bf16 %v1591_v42, %v1590_v41 }
 0x575   :  { %v1619_v46 = vpack.c.bf16 %v1589_v44, %v1588_v43  ;;  %v2705_v48 = vpop.f32.mrb[40].mxu1 }
 0x576   :  { %v1562_v49 = vadd.f32 %v2705_v48, %v1438_v22  ;;  %v1553_v47 = vpop.f32.mrb[41].mxu1 }
 0x577   :  { %v1554_v50 = vadd.f32 %v1553_v47, %v1438_v22  ;;  %v2706_v51 = vpop.f32.mrb[42].mxu1  ;;  %2731 = vmatprep.mubr.bf16.mxu0 %v1619_v46 }
 0x578   :  { %v1565_v52 = vadd.f32 %v2706_v51, %v1438_v22  ;;  %v1556_v53 = vpop.f32.mrb[43].mxu1  ;;  %2732 = vmatmul.mubr.bf16.gmra.mrb[84].mxu0 %v1620_v45  ;;  %v1594_v55 = vmax.f32 %v1562_v49, 0.0  ;;  %v2948_v45 = vld [vmem:[#allocation2 + $0x210] sm:$0xff]  }
 0x579   :  { %v1557_v54 = vadd.f32 %v1556_v53, %v1438_v22  ;;  %v1592_v57 = vmax.f32 %v1554_v50, 0.0  ;;  %v2949_v53 = vld [vmem:[#allocation2 + $0x218] sm:$0xff]  }
 0x57a   :  { %v1595_v56 = vmax.f32 %v1565_v52, 0.0 }
 0x57b   :  { %v1593_v58 = vmax.f32 %v1557_v54, 0.0 }
 0x57c   :  { %v1622_v59 = vpack.c.bf16 %v1595_v56, %v1594_v55 }
 0x57d   :  { %v1621_v60 = vpack.c.bf16 %v1593_v58, %v1592_v57  ;;  %v2709_v61 = vpop.f32.mrb[44].mxu1 }
 0x57e   :  { %v1578_v62 = vadd.f32 %v2709_v61, %v1438_v22  ;;  %v1569_v63 = vpop.f32.mrb[45].mxu1  ;;  %v2950_v61 = vld [vmem:[#allocation2 + $0x220] sm:$0xff]  }
 0x57f   :  { %v1570_v0 = vadd.f32 %v1569_v63, %v1438_v22  ;;  %v2710_v3 = vpop.f32.mrb[46].mxu1  ;;  %2735 = vmatprep.mubr.bf16.mxu0 %v1621_v60 }
 0x580   :  { %v1581_v4 = vadd.f32 %v2710_v3, %v1438_v22  ;;  %v1572_v5 = vpop.f32.mrb[47].mxu1  ;;  %2736 = vmatmul.mubr.bf16.gmra.mrb[88].mxu0 %v1622_v59  ;;  %v1598_v7 = vmax.f32 %v1578_v62, 0.0 }
 0x581   :  { %v1573_v6 = vadd.f32 %v1572_v5, %v1438_v22  ;;  %v1596_v9 = vmax.f32 %v1570_v0, 0.0  ;;  %v3242_v22 = vld [vmem:[%s3290_s5 + $0x8] sm:$0x7]  ;;  %s3006_s5 = smov [#allocation5]  }
 0x582   :  { %v1599_v8 = vmax.f32 %v1581_v4, 0.0  ;;  %v3247_v15 = vrot.slane %v3242_v22, %v63_v21  ;;  %s2191_s28 = sshll.u32 %s3006_s5, 4  ;;  %s2192_s28 = int_to_ptr.vmem [resolvable:$true] %s2191_s28 }
 0x583   :  { %v1597_v2 = vmax.f32 %v1573_v6, 0.0  ;;  %s2977_s29 = scalar_lea.vmem %s2192_s28, 2048  ;;  %p2982_p9 = scmp.lt.s32.totalorder %s2192_s28, %s2192_s28 }
 0x584   :  { %v1624_v10 = vpack.c.bf16 %v1599_v8, %v1598_v7  ;;  %v2951_v7 = vld [vmem:[#allocation2 + $0x228] sm:$0xff]   ;;  %p2978_p8 = scmp.ne.s32.totalorder %s2192_s28, %s2977_s29  ;;  %p2983_p10 = scmp.lt.s32.totalorder %s2977_s29, %s2977_s29 }
 0x585   :  { %v1623_v11 = vpack.c.bf16 %v1597_v2, %v1596_v9 }
 0x586   :  { %p2984_p11 = por %p2983_p10, %p2982_p9 }
 0x587   :  { %2739 = vmatprep.mubr.bf16.mxu0 %v1623_v11 }
 0x588   :  { %2740 = vmatmul.mubr.bf16.gmra.mrb[92].mxu0 %v1624_v10  ;;  %p2985_p12 = pnand %p2984_p11, %p2978_p8 }
 0x643   :  { %v2729_v16 = vpop.f32.mrb[80].mxu0 }
 0x644   :  { %v1720_v17 = vadd.f32 %v2729_v16, %v3247_v15  ;;  %v1711_v18 = vpop.f32.mrb[81].mxu0 }
 0x645   :  { %v1712_v19 = vadd.f32 %v1711_v18, %v3247_v15  ;;  %v2730_v24 = vpop.f32.mrb[82].mxu0 }
 0x646   :  { %v1723_v25 = vadd.f32 %v2730_v24, %v3247_v15  ;;  %v1714_v26 = vpop.f32.mrb[83].mxu0  ;;  %v1776_v28 = vmax.f32 %v1720_v17, 0.0  ;;  %v2953_v24 = vld [vmem:[#allocation2 + $0x238] sm:$0xff]  }
 0x647   :  { %v1715_v27 = vadd.f32 %v1714_v26, %v3247_v15  ;;  %v1774_v29 = vmax.f32 %v1712_v19, 0.0  ;;  %v2952_v19 = vld [vmem:[#allocation2 + $0x230] sm:$0xff]  }
 0x648   :  { %v1777_v23 = vmax.f32 %v1723_v25, 0.0 }
 0x649   :  { %v1775_v30 = vmax.f32 %v1715_v27, 0.0 }
 0x64a   :  { %v1808_v31 = vpack.c.bf16 %v1777_v23, %v1776_v28 }
 0x64b   :  { %v1807_v34 = vpack.c.bf16 %v1775_v30, %v1774_v29  ;;  %v2733_v21 = vpop.f32.mrb[84].mxu0 }
 0x64c   :  { %v1736_v33 = vadd.f32 %v2733_v21, %v3247_v15  ;;  %v1727_v35 = vpop.f32.mrb[85].mxu0 }
 0x64d   :  { %v1728_v37 = vadd.f32 %v1727_v35, %v3247_v15  ;;  %v2734_v40 = vpop.f32.mrb[86].mxu0  ;;  %2759 = vmatprep.mubr.bf16.mxu1 %v1807_v34 }
 0x64e   :  { %v1739_v39 = vadd.f32 %v2734_v40, %v3247_v15  ;;  %v1730_v41 = vpop.f32.mrb[87].mxu0  ;;  %2760 = vmatmul.mubr.bf16.vlgmr.msra.gmra.mrb[48].mxu1 %v1808_v31  ;;  %v1780_v43 = vmax.f32 %v1736_v33, 0.0 }
 0x64f   :  { %v1731_v42 = vadd.f32 %v1730_v41, %v3247_v15  ;;  %2776 = vmatpush3.bf16.msra.mxu1 %v2946_v14  ;;  %v1778_v46 = vmax.f32 %v1728_v37, 0.0 }
 0x650   :  { %v1781_v44 = vmax.f32 %v1739_v39, 0.0  ;;  %2777 = vmatprep.subr.bf16.mxu1 %v2947_v36 }
 0x651   :  { %v1779_v48 = vmax.f32 %v1731_v42, 0.0 }
 0x652   :  { %v1810_v49 = vpack.c.bf16 %v1781_v44, %v1780_v43 }
 0x653   :  { %v1809_v47 = vpack.c.bf16 %v1779_v48, %v1778_v46  ;;  %v2737_v50 = vpop.f32.mrb[88].mxu0  ;;  %2778 = vmatpush3.bf16.msra.mxu1 %v2947_v36 }
 0x654   :  { %v1752_v51 = vadd.f32 %v2737_v50, %v3247_v15  ;;  %v1743_v52 = vpop.f32.mrb[89].mxu0  ;;  %2779 = vmatprep.subr.bf16.mxu1 %v2948_v45 }
 0x655   :  { %v1744_v54 = vadd.f32 %v1743_v52, %v3247_v15  ;;  %v2738_v55 = vpop.f32.mrb[90].mxu0  ;;  %2763 = vmatprep.mubr.bf16.mxu1 %v1809_v47 }
 0x656   :  { %v1755_v56 = vadd.f32 %v2738_v55, %v3247_v15  ;;  %v1746_v57 = vpop.f32.mrb[91].mxu0  ;;  %2764 = vmatmul.mubr.bf16.gmra.mrb[52].mxu1 %v1810_v49  ;;  %v1784_v59 = vmax.f32 %v1752_v51, 0.0 }
 0x657   :  { %v1747_v58 = vadd.f32 %v1746_v57, %v3247_v15  ;;  %2780 = vmatpush3.bf16.msra.mxu1 %v2948_v45  ;;  %v1782_v62 = vmax.f32 %v1744_v54, 0.0 }
 0x658   :  { %v1785_v60 = vmax.f32 %v1755_v56, 0.0  ;;  %2781 = vmatprep.subr.bf16.mxu1 %v2949_v53 }
 0x659   :  { %v1783_v63 = vmax.f32 %v1747_v58, 0.0 }
 0x65a   :  { %v1812_v0 = vpack.c.bf16 %v1785_v60, %v1784_v59 }
 0x65b   :  { %v1811_v3 = vpack.c.bf16 %v1783_v63, %v1782_v62  ;;  %v2741_v4 = vpop.f32.mrb[92].mxu0  ;;  %2782 = vmatpush3.bf16.msra.mxu1 %v2949_v53 }
 0x65c   :  { %v1768_v5 = vadd.f32 %v2741_v4, %v3247_v15  ;;  %v1759_v6 = vpop.f32.mrb[93].mxu0  ;;  %2783 = vmatprep.subr.bf16.mxu1 %v2950_v61 }
 0x65d   :  { %v1760_v8 = vadd.f32 %v1759_v6, %v3247_v15  ;;  %v2742_v9 = vpop.f32.mrb[94].mxu0  ;;  %2767 = vmatprep.mubr.bf16.mxu1 %v1811_v3 }
 0x65e   :  { %v1771_v2 = vadd.f32 %v2742_v9, %v3247_v15  ;;  %v1762_v10 = vpop.f32.mrb[95].mxu0  ;;  %2768 = vmatmul.mubr.bf16.gmra.mrb[56].mxu1 %v1812_v0  ;;  %v1788_v1 = vmax.f32 %v1768_v5, 0.0 }
 0x65f   :  { %v1763_v11 = vadd.f32 %v1762_v10, %v3247_v15  ;;  %2784 = vmatpush3.bf16.msra.mxu1 %v2950_v61  ;;  %v1786_v14 = vmax.f32 %v1760_v8, 0.0  ;;  %v1818_v15 = vrot.slane %v3242_v22, %v281_v32 }
 0x660   :  { %v1789_v12 = vmax.f32 %v1771_v2, 0.0  ;;  %2785 = vmatprep.subr.bf16.mxu1 %v2951_v7 }
 0x661   :  { %v1787_v16 = vmax.f32 %v1763_v11, 0.0 }
 0x662   :  { %v1814_v17 = vpack.c.bf16 %v1789_v12, %v1788_v1 }
 0x663   :  { %v1813_v18 = vpack.c.bf16 %v1787_v16, %v1786_v14  ;;  %2786 = vmatpush3.bf16.msra.mxu1 %v2951_v7 }
 0x664   :  { %2787 = vmatprep.subr.bf16.mxu1 %v2952_v19 }
 0x665   :  { %2771 = vmatprep.mubr.bf16.mxu1 %v1813_v18  ;;  %v1041_v18 = vsub.s32 5, %v3094_v20 }
 0x666   :  { %2772 = vmatmul.mubr.bf16.gmra.mrb[60].mxu1 %v1814_v17 }
 0x667   :  { %2788 = vmatpush3.bf16.msra.mxu1 %v2952_v19  ;;  %v1042_v19 = vrot.slane %v3236_v13, %v1041_v18 }
 0x668   :  { %2789 = vmatprep.subr.bf16.mxu1 %v2953_v24 }
 0x66b   :  { %2790 = vmatpush3.bf16.msra.mxu1 %v2953_v24  ;;  %v2008_v24 = vrot.slane %v3242_v22, %v471_v38 }
 0x721   :  { %v2761_v25 = vpop.f32.mrb[48].mxu1 }
 0x722   :  { %v1910_v26 = vadd.f32 %v2761_v25, %v1818_v15  ;;  %v1901_v27 = vpop.f32.mrb[49].mxu1  ;;  %v2809_v25 = vadd.f32 %v2008_v24, %v1042_v19 }
 0x723   :  { %v1902_v28 = vadd.f32 %v1901_v27, %v1818_v15  ;;  %v2762_v23 = vpop.f32.mrb[50].mxu1 }
 0x724   :  { %v1913_v29 = vadd.f32 %v2762_v23, %v1818_v15  ;;  %v1904_v30 = vpop.f32.mrb[51].mxu1  ;;  %v1966_v34 = vmax.f32 %v1910_v26, 0.0 }
 0x725   :  { %v1905_v31 = vadd.f32 %v1904_v30, %v1818_v15  ;;  %v1964_v33 = vmax.f32 %v1902_v28, 0.0 }
 0x726   :  { %v1967_v21 = vmax.f32 %v1913_v29, 0.0 }
 0x727   :  { %v1965_v35 = vmax.f32 %v1905_v31, 0.0 }
 0x728   :  { %v1998_v36 = vpack.c.bf16 %v1967_v21, %v1966_v34 }
 0x729   :  { %v1997_v37 = vpack.c.bf16 %v1965_v35, %v1964_v33  ;;  %v2765_v40 = vpop.f32.mrb[52].mxu1 }
 0x72a   :  { %v1926_v39 = vadd.f32 %v2765_v40, %v1818_v15  ;;  %v1917_v41 = vpop.f32.mrb[53].mxu1 }
 0x72b   :  { %v1918_v42 = vadd.f32 %v1917_v41, %v1818_v15  ;;  %v2766_v43 = vpop.f32.mrb[54].mxu1  ;;  %2791 = vmatprep.mubr.bf16.mxu1 %v1997_v37 }
 0x72c   :  { %v1929_v32 = vadd.f32 %v2766_v43, %v1818_v15  ;;  %v1920_v44 = vpop.f32.mrb[55].mxu1  ;;  %2792 = vmatmul.mubr.bf16.vlgmr.msra.gmra.mrb[16].mxu1 %v1998_v36  ;;  %v1970_v46 = vmax.f32 %v1926_v39, 0.0 }
 0x72d   :  { %v1921_v45 = vadd.f32 %v1920_v44, %v1818_v15  ;;  %v1968_v49 = vmax.f32 %v1918_v42, 0.0 }
 0x72e   :  { %v1971_v48 = vmax.f32 %v1929_v32, 0.0 }
 0x72f   :  { %v1969_v47 = vmax.f32 %v1921_v45, 0.0 }
 0x730   :  { %v2000_v50 = vpack.c.bf16 %v1971_v48, %v1970_v46 }
 0x731   :  { %v1999_v51 = vpack.c.bf16 %v1969_v47, %v1968_v49  ;;  %v2769_v52 = vpop.f32.mrb[56].mxu1 }
 0x732   :  { %v1942_v53 = vadd.f32 %v2769_v52, %v1818_v15  ;;  %v1933_v54 = vpop.f32.mrb[57].mxu1 }
 0x733   :  { %v1934_v55 = vadd.f32 %v1933_v54, %v1818_v15  ;;  %v2770_v56 = vpop.f32.mrb[58].mxu1  ;;  %2795 = vmatprep.mubr.bf16.mxu1 %v1999_v51 }
 0x734   :  { %v1945_v57 = vadd.f32 %v2770_v56, %v1818_v15  ;;  %v1936_v58 = vpop.f32.mrb[59].mxu1  ;;  %2796 = vmatmul.mubr.bf16.gmra.mrb[20].mxu1 %v2000_v50  ;;  %v1974_v60 = vmax.f32 %v1942_v53, 0.0 }
 0x735   :  { %v1937_v59 = vadd.f32 %v1936_v58, %v1818_v15  ;;  %v1972_v62 = vmax.f32 %v1934_v55, 0.0 }
 0x736   :  { %v1975_v61 = vmax.f32 %v1945_v57, 0.0 }
 0x737   :  { %v1973_v63 = vmax.f32 %v1937_v59, 0.0 }
 0x738   :  { %v2002_v0 = vpack.c.bf16 %v1975_v61, %v1974_v60 }
 0x739   :  { %v2001_v3 = vpack.c.bf16 %v1973_v63, %v1972_v62  ;;  %v2773_v4 = vpop.f32.mrb[60].mxu1 }
 0x73a   :  { %v1958_v5 = vadd.f32 %v2773_v4, %v1818_v15  ;;  %v1949_v6 = vpop.f32.mrb[61].mxu1 }
 0x73b   :  { %v1950_v7 = vadd.f32 %v1949_v6, %v1818_v15  ;;  %v2774_v8 = vpop.f32.mrb[62].mxu1  ;;  %2799 = vmatprep.mubr.bf16.mxu1 %v2001_v3 }
 0x73c   :  { %v1961_v9 = vadd.f32 %v2774_v8, %v1818_v15  ;;  %v1952_v2 = vpop.f32.mrb[63].mxu1  ;;  %2800 = vmatmul.mubr.bf16.gmra.mrb[24].mxu1 %v2002_v0  ;;  %v1978_v11 = vmax.f32 %v1958_v5, 0.0 }
 0x73d   :  { %v1953_v10 = vadd.f32 %v1952_v2, %v1818_v15  ;;  %v1976_v12 = vmax.f32 %v1950_v7, 0.0 }
 0x73e   :  { %v1979_v1 = vmax.f32 %v1961_v9, 0.0 }
 0x73f   :  { %v1977_v14 = vmax.f32 %v1953_v10, 0.0 }
 0x740   :  { %v2004_v16 = vpack.c.bf16 %v1979_v1, %v1978_v11 }
 0x741   :  { %v2003_v17 = vpack.c.bf16 %v1977_v14, %v1976_v12 }
 0x743   :  { %2803 = vmatprep.mubr.bf16.mxu1 %v2003_v17 }
 0x744   :  { %2804 = vmatmul.mubr.bf16.gmra.mrb[28].mxu1 %v2004_v16 }
 0x7ff   :  { %v2793_v26 = vpop.f32.mrb[16].mxu1 }
 0x800   :  { %v2808_v27 = vadd.f32 %v2809_v25, %v2793_v26  ;;  %v2091_v15 = vpop.f32.mrb[17].mxu1 }
 0x801   :  { %v2810_v28 = vadd.f32 %v2809_v25, %v2091_v15  ;;  %v2794_v23 = vpop.f32.mrb[18].mxu1 }
 0x802   :  { %2172 = vst [vmem:[#allocation5 + $0x10] sm:$0xff] %v2808_v27  ;;  %v2812_v29 = vadd.f32 %v2809_v25, %v2794_v23  ;;  %v2094_v30 = vpop.f32.mrb[19].mxu1 }
 0x803   :  { %2170 = vst [vmem:[#allocation5] sm:$0xff] %v2810_v28  ;;  %v2814_v31 = vadd.f32 %v2809_v25, %v2094_v30 }
 0x804   :  { %2173 = vst [vmem:[#allocation5 + $0x18] sm:$0xff] %v2812_v29 }
 0x805   :  { %2171 = vst [vmem:[#allocation5 + $0x8] sm:$0xff] %v2814_v31 }
 0x807   :  { %v2797_v34 = vpop.f32.mrb[20].mxu1 }
 0x808   :  { %v2816_v21 = vadd.f32 %v2809_v25, %v2797_v34  ;;  %v2107_v13 = vpop.f32.mrb[21].mxu1 }
 0x809   :  { %v2818_v33 = vadd.f32 %v2809_v25, %v2107_v13  ;;  %v2798_v20 = vpop.f32.mrb[22].mxu1 }
 0x80a   :  { %2176 = vst [vmem:[#allocation5 + $0x30] sm:$0xff] %v2816_v21  ;;  %v2820_v38 = vadd.f32 %v2809_v25, %v2798_v20  ;;  %v2110_v22 = vpop.f32.mrb[23].mxu1 }
 0x80b   :  { %2174 = vst [vmem:[#allocation5 + $0x20] sm:$0xff] %v2818_v33  ;;  %v2822_v35 = vadd.f32 %v2809_v25, %v2110_v22 }
 0x80c   :  { %2177 = vst [vmem:[#allocation5 + $0x38] sm:$0xff] %v2820_v38 }
 0x80d   :  { %2175 = vst [vmem:[#allocation5 + $0x28] sm:$0xff] %v2822_v35 }
 0x80f   :  { %v2801_v36 = vpop.f32.mrb[24].mxu1 }
 0x810   :  { %v2824_v37 = vadd.f32 %v2809_v25, %v2801_v36  ;;  %v2123_v40 = vpop.f32.mrb[25].mxu1 }
 0x811   :  { %v2826_v39 = vadd.f32 %v2809_v25, %v2123_v40  ;;  %v2802_v41 = vpop.f32.mrb[26].mxu1 }
 0x812   :  { %2180 = vst [vmem:[#allocation5 + $0x50] sm:$0xff] %v2824_v37  ;;  %v2828_v42 = vadd.f32 %v2809_v25, %v2802_v41  ;;  %v2126_v43 = vpop.f32.mrb[27].mxu1 }
 0x813   :  { %2178 = vst [vmem:[#allocation5 + $0x40] sm:$0xff] %v2826_v39  ;;  %v2830_v32 = vadd.f32 %v2809_v25, %v2126_v43 }
 0x814   :  { %2181 = vst [vmem:[#allocation5 + $0x58] sm:$0xff] %v2828_v42 }
 0x815   :  { %2179 = vst [vmem:[#allocation5 + $0x48] sm:$0xff] %v2830_v32 }
 0x817   :  { %v2805_v44 = vpop.f32.mrb[28].mxu1 }
 0x818   :  { %v2832_v45 = vadd.f32 %v2809_v25, %v2805_v44  ;;  %v2139_v46 = vpop.f32.mrb[29].mxu1 }
 0x819   :  { %v2834_v48 = vadd.f32 %v2809_v25, %v2139_v46  ;;  %v2806_v49 = vpop.f32.mrb[30].mxu1 }
 0x81a   :  { %2184 = vst [vmem:[#allocation5 + $0x70] sm:$0xff] %v2832_v45  ;;  %v2836_v47 = vadd.f32 %v2809_v25, %v2806_v49  ;;  %v2142_v50 = vpop.f32.mrb[31].mxu1 }
 0x81b   :  { %2182 = vst [vmem:[#allocation5 + $0x60] sm:$0xff] %v2834_v48  ;;  %v2838_v51 = vadd.f32 %v2809_v25, %v2142_v50 }
 0x81c   :  { %2185 = vst [vmem:[#allocation5 + $0x78] sm:$0xff] %v2836_v47 }
 0x81d   :  { %2183 = vst [vmem:[#allocation5 + $0x68] sm:$0xff] %v2838_v51 }
 0x81e   :  { %2988 = shalt.err (!%p2985_p12)
}
 0x81f   :  { %s2989_s7 = scalar_lea.hbm %s3291_s6, 2048 }
 0x820   :  { %p2990_p13 = scmp.ne.s32.totalorder %s3291_s6, %s2989_s7  ;;  %p2993_p0 = scmp.lt.u32.totalorder %s2989_s7, %s3291_s6 }
 0x822   :  { %p2995_p1 = pnand %p2993_p0, %p2990_p13 }
 0x824   :  { %2998 = shalt.err (!%p2995_p1)
}
 0x825   :  { %s3007_s3 = smov 128   ;;  %s3008_s12 = smov 8  }
 0x826   :  { %2197 = dma.vmem_to_hbm [thread:$0]  %s2192_s28, 2048, %s3291_s6, [#allocation4], %s3007_s3, %s3007_s3, %s3008_s12  }
 0x827   :  { %3001 = dma.done.wait [#allocation4], 2048  }
 0x828   :  { %3002 = vsyncadd [#allocation4], 4294965248 }
 0x829   :  { %2201 = vsyncpa [#allocation3], 1 }
 0x82a   :  { %2202 = vsyncpa [#allocation4], 1 }

</bundles_post_ra>
